<compile_context>
chip_gen: v7x
topology: tpu7x:2x2x1
jax: 0.10.0
libtpu: 0.0.40
codegen_flags: <defaults>
</compile_context>

<pallas_src>
import math

import jax
import jax.numpy as jnp
from jax import lax
from jax.experimental import pallas as pl
from jax.experimental.pallas import tpu as pltpu

_MIB = 1024 * 1024


def _mlp_kernel(x_ref, w1t_ref, b1_ref, w2t_ref, b2_ref, o_ref):
    x = x_ref[...]                                            # (TM, d_in)
    # Layer 1: x @ W1^T + b1, ReLU.  W1 was pre-transposed to (d_in, hidden),
    # so this is a plain MXU contraction (no per-step RHS transpose on the XLU).
    h = jnp.dot(x, w1t_ref[...], preferred_element_type=jnp.float32)
    h = jnp.maximum(h + b1_ref[...], 0.0)                     # bias + clamp(min=0)
    # Deliberate: 2nd matmul's LHS stays in the model dtype (bf16 models stay
    # bf16 on the MXU); accumulation remains f32 via preferred_element_type.
    h = h.astype(x.dtype)
    # Layer 2: h @ W2^T + b2.  W2 pre-transposed to (hidden, d_out).
    y = jnp.dot(h, w2t_ref[...], preferred_element_type=jnp.float32)
    o_ref[...] = (y + b2_ref[...]).astype(o_ref.dtype)


def _round_up(a, b):
    return ((a + b - 1) // b) * b


def _vmem_capacity_bytes():
    """Physical VMEM per TensorCore; conservative (v7x = 64 MiB) fallback."""
    try:
        return int(pltpu.get_tpu_info().vmem_capacity_bytes)
    except Exception:
        return 64 * _MIB


def two_layer_net(x, w1, b1, w2, b2, *, batch_tile=None, vmem_budget_bytes=None):
    """Forward pass of TwoLayerNet.

    x:  (N, d_in)
    w1: (hidden, d_in), b1: (hidden,)   -- PyTorch nn.Linear layout
    w2: (d_out, hidden), b2: (d_out,)

    Weights are transposed once here (outside the kernel); for repeated calls /
    training loops, store them pre-transposed to avoid the per-call transpose.
    """
    n, d_in = x.shape
    hidden, d_in_w = w1.shape
    d_out, hidden_w = w2.shape
    assert d_in_w == d_in and hidden_w == hidden

    itemsize = jnp.dtype(x.dtype).itemsize
    vmem_cap = _vmem_capacity_bytes()
    # Leave headroom for compiler-internal scratch: never request full VMEM.
    vmem_ceiling = min(vmem_cap - 8 * _MIB, 112 * _MIB)       # ~56 MiB on v7x
    if vmem_budget_bytes is None:
        # v5e/v6e (128 MiB): generous budget; v7x (64 MiB/TC): stay conservative.
        vmem_budget_bytes = 80 * _MIB if vmem_cap >= 96 * _MIB else 44 * _MIB
    vmem_budget_bytes = min(int(vmem_budget_bytes), vmem_ceiling)

    # VMEM accounting:
    #   fixed: W1t + W2t + biases, single-buffered (pipeline_mode=Buffered(1)).
    #   per row: double-buffered x and out tiles + f32 h and f32 pre-cast y.
    fixed_bytes = (d_in * hidden + hidden * d_out + hidden + d_out) * itemsize
    per_row_bytes = 2 * (d_in + d_out) * itemsize + 4 * (hidden + d_out)

    if fixed_bytes + 8 * per_row_bytes > vmem_budget_bytes:
        # TODO(synk): tile hidden/d_out (and consider fp8 weights on v7x) when the
        # weight matrices do not fit VMEM-resident; this kernel assumes residency.
        raise ValueError(
            f"TwoLayerNet weights ({fixed_bytes} B) do not fit the VMEM budget "
            f"({vmem_budget_bytes} B); weight tiling is not implemented.")

    if batch_tile is None:
        avail = max(vmem_budget_bytes - fixed_bytes, per_row_bytes)
        tm = max(int(avail // per_row_bytes), 8)
        if tm >= 128:
            tm = (tm // 128) * 128        # dtype-agnostic sublane/lane alignment
        else:
            tm = max((tm // 8) * 8, 8)
        if tm >= n:
            if n > 128:
                # >= 2 grid steps so both v7x TensorCores get work under the
                # "parallel" batch axis (harmless on single-TC v5e/v6e).
                tm = max(128, _round_up(pl.cdiv(n, 2), 128))
                tm = min(tm, _round_up(n, 128))
            else:
                tm = n                    # full-dim block is always legal
        batch_tile = tm
    tm = int(batch_tile)

    grid = (pl.cdiv(n, tm),)

    # One-time layout fixes outside the kernel: transpose weights so the MXU gets
    # plain contractions; biases as 2-D rows for clean broadcasting.
    w1_t = w1.T                       # (d_in, hidden)
    w2_t = w2.T                       # (hidden, d_out)
    b1_2d = b1.reshape(1, hidden)
    b2_2d = b2.reshape(1, d_out)

    flops = 2 * n * (d_in * hidden + hidden * d_out)
    bytes_accessed = (x.size + w1.size + w2.size + b1.size + b2.size
                      + n * d_out) * itemsize

    vmem_need = fixed_bytes + tm * per_row_bytes
    vmem_limit = int(min(vmem_ceiling,
                         max(vmem_need + vmem_need // 2, 32 * _MIB)))

    def build(use_buffered):
        res_kw = {"pipeline_mode": pl.Buffered(1)} if use_buffered else {}
        in_specs = [
            # x: streamed over the batch (double-buffered by default; bump to
            # pl.Buffered(3) only if profiling shows the x DMA exposed).
            pl.BlockSpec((tm, d_in), lambda i: (i, 0)),
            # VMEM-resident, single-buffered operands (constant index_map).
            pl.BlockSpec((d_in, hidden), lambda i: (0, 0), **res_kw),   # W1^T
            pl.BlockSpec((1, hidden), lambda i: (0, 0), **res_kw),      # b1
            pl.BlockSpec((hidden, d_out), lambda i: (0, 0), **res_kw),  # W2^T
            pl.BlockSpec((1, d_out), lambda i: (0, 0), **res_kw),       # b2
        ]
        out_specs = pl.BlockSpec((tm, d_out), lambda i: (i, 0))
        return pl.pallas_call(
            _mlp_kernel,
            out_shape=jax.ShapeDtypeStruct((n, d_out), x.dtype),
            grid_spec=pl.GridSpec(grid=grid, in_specs=in_specs,
                                  out_specs=out_specs),
            compiler_params=pltpu.CompilerParams(
                # Independent batch tiles -> megacore sharding on v7x (2 TCs).
                dimension_semantics=("parallel",),
                vmem_limit_bytes=vmem_limit,
            ),
            cost_estimate=pl.CostEstimate(
                flops=flops, transcendentals=0, bytes_accessed=bytes_accessed),
        )

    args = (x, w1_t, b1_2d, w2_t, b2_2d)
    try:
        return build(True)(*args)
    except Exception:
        # Compatibility fallback: some JAX versions reject pipeline_mode /
        # Buffered(1); default double-buffered residents are correct, just use
        # 2x weight VMEM.
        return build(False)(*args)


def _init_linear(key, out_features, in_features, dtype=jnp.float32):
    """Deterministic PyTorch-like Linear init: U(-1/sqrt(fan_in), 1/sqrt(fan_in))."""
    kw, kb = jax.random.split(key)
    bound = 1.0 / math.sqrt(in_features)
    w = jax.random.uniform(kw, (out_features, in_features), dtype, -bound, bound)
    b = jax.random.uniform(kb, (out_features,), dtype, -bound, bound)
    return w, b


if __name__ == "__main__":
    # Small but MXU-friendly shapes (256-multiples fill the 256-wide MXU on
    # v6e/v7x; d_out multiple of 128 keeps output stores unmasked).
    N, D_IN, HIDDEN, D_OUT = 256, 256, 256, 256

    key = jax.random.PRNGKey(0)
    kx, k1, k2 = jax.random.split(key, 3)

    x = jax.random.normal(kx, (N, D_IN), jnp.float32)
    w1, b1 = _init_linear(k1, HIDDEN, D_IN)
    w2, b2 = _init_linear(k2, D_OUT, HIDDEN)

    # Auto-derived batch tile -> TM=128, grid of 2 "parallel" steps.
    y = two_layer_net(x, w1, b1, w2, b2)
    y = jax.block_until_ready(y)

    # Pure-JAX reference of the forward semantics (high-precision matmuls).
    h_ref = jnp.maximum(
        jnp.matmul(x, w1.T, precision=lax.Precision.HIGHEST) + b1, 0.0)
    y_ref = jnp.matmul(h_ref, w2.T, precision=lax.Precision.HIGHEST) + b2
    assert y.shape == (N, D_OUT)
    assert jnp.allclose(y, y_ref, atol=2e-4, rtol=2e-4), float(
        jnp.max(jnp.abs(y - y_ref)))

    print("KERNEL_OK")
</pallas_src>

<mosaic_0001>
module attributes {stable_mosaic.version = 11 : i64} {
  func.func @_mlp_kernel(%arg0: i32, %arg1: memref<128x256xf32, #tpu.memory_space<vmem>>, %arg2: memref<256x256xf32, #tpu.memory_space<vmem>>, %arg3: memref<1x256xf32, #tpu.memory_space<vmem>>, %arg4: memref<256x256xf32, #tpu.memory_space<vmem>>, %arg5: memref<1x256xf32, #tpu.memory_space<vmem>>, %arg6: memref<128x256xf32, #tpu.memory_space<vmem>>) attributes {dimension_semantics = [#tpu.dimension_semantics<parallel>], iteration_bounds = array<i64: 2>, scalar_prefetch = 0 : i64, scratch_operands = 0 : i64, tpu.core_type = #tpu.core_type<tc>, window_params = [{transform_indices = @transform_0, window_bounds = array<i64: 128, 256>}, {pipeline_mode = #tpu.pipeline_mode<synchronous>, transform_indices = @transform_1, window_bounds = array<i64: 256, 256>}, {pipeline_mode = #tpu.pipeline_mode<synchronous>, transform_indices = @transform_2, window_bounds = array<i64: 1, 256>}, {pipeline_mode = #tpu.pipeline_mode<synchronous>, transform_indices = @transform_3, window_bounds = array<i64: 256, 256>}, {pipeline_mode = #tpu.pipeline_mode<synchronous>, transform_indices = @transform_4, window_bounds = array<i64: 1, 256>}, {transform_indices = @transform_5, window_bounds = array<i64: 128, 256>}]} {
    %c0 = arith.constant 0 : index
    %c0_0 = arith.constant 0 : index
    %0 = vector.load %arg1[%c0, %c0_0] : memref<128x256xf32, #tpu.memory_space<vmem>>, vector<128x256xf32>
    %c0_1 = arith.constant 0 : index
    %c0_2 = arith.constant 0 : index
    %1 = vector.load %arg2[%c0_1, %c0_2] : memref<256x256xf32, #tpu.memory_space<vmem>>, vector<256x256xf32>
    %cst = arith.constant dense<0.000000e+00> : vector<128x256xf32>
    %2 = tpu.matmul %0, %1, %cst {dimension_numbers = #tpu.dot_dimension_numbers<[1], [0], [0], [1], [0, 0, 1, 1], [], []>} : vector<128x256xf32>, vector<256x256xf32>, vector<128x256xf32> -> vector<128x256xf32>
    %c0_3 = arith.constant 0 : index
    %c0_4 = arith.constant 0 : index
    %3 = vector.load %arg3[%c0_3, %c0_4] : memref<1x256xf32, #tpu.memory_space<vmem>>, vector<1x256xf32>
    %4 = vector.broadcast %3 : vector<1x256xf32> to vector<128x256xf32>
    %5 = arith.addf %2, %4 : vector<128x256xf32>
    %cst_5 = arith.constant 0.000000e+00 : f32
    %6 = vector.broadcast %cst_5 : f32 to vector<128x256xf32>
    %7 = arith.maximumf %5, %6 : vector<128x256xf32>
    %c0_6 = arith.constant 0 : index
    %c0_7 = arith.constant 0 : index
    %8 = vector.load %arg4[%c0_6, %c0_7] : memref<256x256xf32, #tpu.memory_space<vmem>>, vector<256x256xf32>
    %cst_8 = arith.constant dense<0.000000e+00> : vector<128x256xf32>
    %9 = tpu.matmul %7, %8, %cst_8 {dimension_numbers = #tpu.dot_dimension_numbers<[1], [0], [0], [1], [0, 0, 1, 1], [], []>} : vector<128x256xf32>, vector<256x256xf32>, vector<128x256xf32> -> vector<128x256xf32>
    %c0_9 = arith.constant 0 : index
    %c0_10 = arith.constant 0 : index
    %10 = vector.load %arg5[%c0_9, %c0_10] : memref<1x256xf32, #tpu.memory_space<vmem>>, vector<1x256xf32>
    %11 = vector.broadcast %10 : vector<1x256xf32> to vector<128x256xf32>
    %12 = arith.addf %9, %11 : vector<128x256xf32>
    %c0_11 = arith.constant 0 : index
    %c0_12 = arith.constant 0 : index
    %13 = vector.load %arg6[%c0_11, %c0_12] : memref<128x256xf32, #tpu.memory_space<vmem>>, vector<128x256xf32>
    tpu.vector_store %arg6[%c0_11, %c0_12], %12 {strides = array<i32>} : memref<128x256xf32, #tpu.memory_space<vmem>>, vector<128x256xf32>,
    return
  }
  func.func @transform_0(%arg0: i32) -> (i32, i32) {
    %c0_i32 = arith.constant 0 : i32
    %c0_i32_0 = arith.constant 0 : i32
    return %arg0, %c0_i32 : i32, i32
  }
  func.func @transform_1(%arg0: i32) -> (i32, i32) {
    %c0_i32 = arith.constant 0 : i32
    %c0_i32_0 = arith.constant 0 : i32
    %c0_i32_1 = arith.constant 0 : i32
    return %c0_i32, %c0_i32_0 : i32, i32
  }
  func.func @transform_2(%arg0: i32) -> (i32, i32) {
    %c0_i32 = arith.constant 0 : i32
    %c0_i32_0 = arith.constant 0 : i32
    %c0_i32_1 = arith.constant 0 : i32
    return %c0_i32, %c0_i32_0 : i32, i32
  }
  func.func @transform_3(%arg0: i32) -> (i32, i32) {
    %c0_i32 = arith.constant 0 : i32
    %c0_i32_0 = arith.constant 0 : i32
    %c0_i32_1 = arith.constant 0 : i32
    return %c0_i32, %c0_i32_0 : i32, i32
  }
  func.func @transform_4(%arg0: i32) -> (i32, i32) {
    %c0_i32 = arith.constant 0 : i32
    %c0_i32_0 = arith.constant 0 : i32
    %c0_i32_1 = arith.constant 0 : i32
    return %c0_i32, %c0_i32_0 : i32, i32
  }
  func.func @transform_5(%arg0: i32) -> (i32, i32) {
    %c0_i32 = arith.constant 0 : i32
    %c0_i32_0 = arith.constant 0 : i32
    return %arg0, %c0_i32 : i32, i32
  }
}

module attributes {stable_mosaic.version = 11 : i64} {
  func.func @_mlp_kernel(%arg0: i32, %arg1: memref<128x256xf32, #tpu.memory_space<vmem>>, %arg2: memref<256x256xf32, #tpu.memory_space<vmem>>, %arg3: memref<1x256xf32, #tpu.memory_space<vmem>>, %arg4: memref<256x256xf32, #tpu.memory_space<vmem>>, %arg5: memref<1x256xf32, #tpu.memory_space<vmem>>, %arg6: memref<128x256xf32, #tpu.memory_space<vmem>>) attributes {dimension_semantics = [#tpu.dimension_semantics<parallel>], iteration_bounds = array<i64: 2>, scalar_prefetch = 0 : i64, scratch_operands = 0 : i64, tpu.core_type = #tpu.core_type<tc>, window_params = [{transform_indices = @transform_0, window_bounds = array<i64: 128, 256>}, {pipeline_mode = #tpu.pipeline_mode<synchronous>, transform_indices = @transform_1, window_bounds = array<i64: 256, 256>}, {pipeline_mode = #tpu.pipeline_mode<synchronous>, transform_indices = @transform_2, window_bounds = array<i64: 1, 256>}, {pipeline_mode = #tpu.pipeline_mode<synchronous>, transform_indices = @transform_3, window_bounds = array<i64: 256, 256>}, {pipeline_mode = #tpu.pipeline_mode<synchronous>, transform_indices = @transform_4, window_bounds = array<i64: 1, 256>}, {transform_indices = @transform_5, window_bounds = array<i64: 128, 256>}]} {
    %c0 = arith.constant 0 : index
    %c0_0 = arith.constant 0 : index
    %0 = vector.load %arg1[%c0, %c0_0] : memref<128x256xf32, #tpu.memory_space<vmem>>, vector<128x256xf32>
    %c0_1 = arith.constant 0 : index
    %c0_2 = arith.constant 0 : index
    %1 = vector.load %arg2[%c0_1, %c0_2] : memref<256x256xf32, #tpu.memory_space<vmem>>, vector<256x256xf32>
    %cst = arith.constant dense<0.000000e+00> : vector<128x256xf32>
    %2 = tpu.matmul %0, %1, %cst {dimension_numbers = #tpu.dot_dimension_numbers<[1], [0], [0], [1], [0, 0, 1, 1], [], []>} : vector<128x256xf32>, vector<256x256xf32>, vector<128x256xf32> -> vector<128x256xf32>
    %c0_3 = arith.constant 0 : index
    %c0_4 = arith.constant 0 : index
    %3 = vector.load %arg3[%c0_3, %c0_4] : memref<1x256xf32, #tpu.memory_space<vmem>>, vector<1x256xf32>
    %4 = vector.broadcast %3 : vector<1x256xf32> to vector<128x256xf32>
    %5 = arith.addf %2, %4 : vector<128x256xf32>
    %cst_5 = arith.constant 0.000000e+00 : f32
    %6 = vector.broadcast %cst_5 : f32 to vector<128x256xf32>
    %7 = arith.maximumf %5, %6 : vector<128x256xf32>
    %c0_6 = arith.constant 0 : index
    %c0_7 = arith.constant 0 : index
    %8 = vector.load %arg4[%c0_6, %c0_7] : memref<256x256xf32, #tpu.memory_space<vmem>>, vector<256x256xf32>
    %cst_8 = arith.constant dense<0.000000e+00> : vector<128x256xf32>
    %9 = tpu.matmul %7, %8, %cst_8 {dimension_numbers = #tpu.dot_dimension_numbers<[1], [0], [0], [1], [0, 0, 1, 1], [], []>} : vector<128x256xf32>, vector<256x256xf32>, vector<128x256xf32> -> vector<128x256xf32>
    %c0_9 = arith.constant 0 : index
    %c0_10 = arith.constant 0 : index
    %10 = vector.load %arg5[%c0_9, %c0_10] : memref<1x256xf32, #tpu.memory_space<vmem>>, vector<1x256xf32>
    %11 = vector.broadcast %10 : vector<1x256xf32> to vector<128x256xf32>
    %12 = arith.addf %9, %11 : vector<128x256xf32>
    %c0_11 = arith.constant 0 : index
    %c0_12 = arith.constant 0 : index
    %13 = vector.load %arg6[%c0_11, %c0_12] : memref<128x256xf32, #tpu.memory_space<vmem>>, vector<128x256xf32>
    tpu.vector_store %arg6[%c0_11, %c0_12], %12 {strides = array<i32>} : memref<128x256xf32, #tpu.memory_space<vmem>>, vector<128x256xf32>,
    return
  }
  func.func @transform_0(%arg0: i32) -> (i32, i32) {
    %c0_i32 = arith.constant 0 : i32
    %c0_i32_0 = arith.constant 0 : i32
    return %arg0, %c0_i32 : i32, i32
  }
  func.func @transform_1(%arg0: i32) -> (i32, i32) {
    %c0_i32 = arith.constant 0 : i32
    %c0_i32_0 = arith.constant 0 : i32
    %c0_i32_1 = arith.constant 0 : i32
    return %c0_i32, %c0_i32_0 : i32, i32
  }
  func.func @transform_2(%arg0: i32) -> (i32, i32) {
    %c0_i32 = arith.constant 0 : i32
    %c0_i32_0 = arith.constant 0 : i32
    %c0_i32_1 = arith.constant 0 : i32
    return %c0_i32, %c0_i32_0 : i32, i32
  }
  func.func @transform_3(%arg0: i32) -> (i32, i32) {
    %c0_i32 = arith.constant 0 : i32
    %c0_i32_0 = arith.constant 0 : i32
    %c0_i32_1 = arith.constant 0 : i32
    return %c0_i32, %c0_i32_0 : i32, i32
  }
  func.func @transform_4(%arg0: i32) -> (i32, i32) {
    %c0_i32 = arith.constant 0 : i32
    %c0_i32_0 = arith.constant 0 : i32
    %c0_i32_1 = arith.constant 0 : i32
    return %c0_i32, %c0_i32_0 : i32, i32
  }
  func.func @transform_5(%arg0: i32) -> (i32, i32) {
    %c0_i32 = arith.constant 0 : i32
    %c0_i32_0 = arith.constant 0 : i32
    return %arg0, %c0_i32 : i32, i32
  }
}

</mosaic_0001>

<bundles_post_ra>
// kernel: tpu_custom_call.1
= control target key start
LH: loop header
LB: loop body
LE: loop exit
PB: predicated region body
PF: predicated region fallthrough
CT: control target
= control target key end

     0   :  { %10 = vsyncpa [#allocation3], 0  ;;  %s1777_s0 = inlined_call_operand.hbm [shape: f32[256,256], index: 0, kind: input, shape index: {}]   ;;  %s1778_s1 = inlined_call_operand.hbm [shape: f32[256,256], index: 1, kind: input, shape index: {}]   ;;  %s1779_s2 = inlined_call_operand.vmem [shape: f32[1,256], index: 2, kind: input, shape index: {}]   ;;  %s1780_s3 = inlined_call_operand.hbm [shape: f32[256,256], index: 3, kind: input, shape index: {}]   ;;  %s1781_s4 = inlined_call_operand.vmem [shape: f32[1,256], index: 4, kind: input, shape index: {}]   ;;  %s1782_s5 = inlined_call_operand.hbm [shape: f32[256,256], index: 5, kind: output, shape index: {}]  }
   0x1   :  { %12 = vsyncpa [#allocation3 + $0x1], 0 }
   0x2   :  { %13 = vsyncpa [#allocation6], 0 }
   0x3   :  { %14 = vsyncpa [#allocation4], 0 }
   0x4   :  { %16 = vsyncpa [#allocation4 + $0x1], 0  ;;  %s1371_s18 = smov 0   ;;  %s1373_s19 = smov 0  }
   0x5   :  { %s1375_s20 = smov 0   ;;  %s1377_s21 = smov 0  }
   0x6 LB: > { %s1392_s22 = sadd.s32 4294967295, %s1331_s21   ;;  %s952_s23 = sadd.s32 4294967294, %s1331_s21   ;;  %s1331_s21 = sphi %s1377_s21, %s1802_s21   ;;  %s1327_s20 = sphi %s1375_s20, %s1801_s20   ;;  %s1323_s19 = sphi %s1373_s19, %s1800_s19   ;;  %s1319_s18 = sphi %s1371_s18, %s1799_s18  }
   0x7   : > { %p42_p0 = scmp.ne.s32.totalorder %s1323_s19, %s1319_s18  ;;  %p1783_p1 = scmp.eq.s32.totalorder %s1392_s22, 0 }
   0x8   : > { %p156_p3 = scmp.eq.s32.totalorder %s952_s23, 1  ;;  %p953_p5 = scmp.ge.s32.totalorder %s1331_s21, 1 }
   0x9   : > { %p1401_p4 = por %p1783_p1, %p42_p0  ;;  %p163_p7 = scmp.lt.s32.totalorder %s1331_s21, 3 }
   0xa   : > { %p1406_p6 = por %p156_p3, %p42_p0  ;;  %s1333_s27 = smov [#allocation5]  }
   0xb   : > { %s1786_s24 = scalar_select %p1401_p4, 1, 0 }
   0xc   : > { %s1787_s25 = scalar_select %p1406_p6, 1, 0 }
   0xd   : > { %p1411_p8 = pnand %p953_p5, %p163_p7  ;;  %s175_s28 = sshll.u32 %s1333_s27, 4  ;;  %s1415_s28 = int_to_ptr.vmem [resolvable:$true] %s175_s28 }
   0xe   : > { %s1334_s30 = smov [#allocation7]   ;;  %s1175_s9 = scalar_lea.hbm %s1778_s1, 8192 }
   0xf   : > { %p1116_p9 = pneg %p1411_p8  ;;  %s191_s6 = sshll.u32 %s1334_s30, 4  ;;  %s1426_s6 = int_to_ptr.vmem [resolvable:$true] %s191_s6 }
  0x10   : > { %p1176_p12 = scmp.ne.s32.totalorder %s1778_s1, %s1175_s9  ;;  %p1182_p5 = scmp.lt.u32.totalorder %s1175_s9, %s1778_s1 }
  0x11   : > { %p1422_p11 = pnand %p1116_p9, %p1783_p1 }
  0x13   : > { %p1177_p13 = pneg %p1422_p11 }
  0x15   : > { %p1178_p0 = pnand %p1177_p13, %p1176_p12 }
  0x17   : > { %p1179_p3 = pneg %p1178_p0 }
  0x19   : > { %p1184_p7 = pnand %p1182_p5, %p1179_p3 }
  0x1b   : > { %1187 = shalt.err (!%p1184_p7)
}
  0x1c   : > { %s1188_s14 = scalar_lea.vmem %s1415_s28, 8192  ;;  %p1196_p2 = scmp.lt.s32.totalorder %s1415_s28, %s1415_s28 }
  0x1d   : > { %p1189_p9 = scmp.ne.s32.totalorder %s1415_s28, %s1188_s14  ;;  %p1197_p12 = scmp.lt.s32.totalorder %s1188_s14, %s1188_s14 }
  0x1f   : > { %p1191_p10 = pnand %p1189_p9, %p1177_p13  ;;  %p1198_p0 = por %p1197_p12, %p1196_p2 }
  0x21   : > { %p1192_p1 = pneg %p1191_p10 }
  0x23   : > { %p1199_p6 = pnand %p1198_p0, %p1192_p1 }
  0x25   : > { %1202 = shalt.err (!%p1199_p6)
}
  0x26   : > { %s1335_s15 = smov 256   ;;  %s1336_s16 = smov 16  }
  0x27   : > { %1119 = dma.hbm_to_vmem [thread:$0]  (!%p1422_p11), %s1778_s1, 8192, %s1415_s28, [#allocation6], %s1335_s15, %s1335_s15, %s1336_s16  }
  0x28   : > { %s1203_s7 = scalar_lea.hbm %s1780_s3, 8192 }
  0x29   : > { %p1204_p1 = scmp.ne.s32.totalorder %s1780_s3, %s1203_s7  ;;  %p1210_p10 = scmp.lt.u32.totalorder %s1203_s7, %s1780_s3 }
  0x2b   : > { %p1206_p2 = pnand %p1204_p1, %p1177_p13 }
  0x2d   : > { %p1207_p6 = pneg %p1206_p2 }
  0x2f   : > { %p1212_p3 = pnand %p1210_p10, %p1207_p6 }
  0x31   : > { %1215 = shalt.err (!%p1212_p3)
}
  0x32   : > { %s1216_s28 = scalar_lea.vmem %s1426_s6, 8192  ;;  %p1224_p12 = scmp.lt.s32.totalorder %s1426_s6, %s1426_s6 }
  0x33   : > { %p1217_p5 = scmp.ne.s32.totalorder %s1426_s6, %s1216_s28  ;;  %p1225_p0 = scmp.lt.s32.totalorder %s1216_s28, %s1216_s28 }
  0x35   : > { %p1219_p7 = pnand %p1217_p5, %p1177_p13  ;;  %p1226_p1 = por %p1225_p0, %p1224_p12 }
  0x37   : > { %p1220_p9 = pneg %p1219_p7 }
  0x39   : > { %p1227_p2 = pnand %p1226_p1, %p1220_p9 }
  0x3b   : > { %1230 = shalt.err (!%p1227_p2)
}
  0x3c   : > { %1122 = dma.hbm_to_vmem [thread:$0]  (!%p1422_p11), %s1780_s3, 8192, %s1426_s6, [#allocation6], %s1335_s15, %s1335_s15, %s1336_s16  }
  0x3d   : > { %s1487_s29 = sadd.s32 1, %s1331_s21   ;;  %s29_s14 = sadd.s32 1, %s1327_s20 }
  0x3e   : > { %s26_s17 = ssub.s32 %s1331_s21, %s1487_s29  ;;  %p36_p13 = scmp.ne.s32.totalorder %s1327_s20, %s1323_s19 }
  0x3f   : > { %p27_p6 = scmp.eq.s32.totalorder %s26_s17, 0  ;;  %p37_p10 = scmp.eq.s32.totalorder %s1331_s21, 0 }
  0x40   : > { %p1790_p3 = scmp.eq.s32.totalorder %s1392_s22, 1  ;;  %p1133_p7 = scmp.lt.s32.totalorder %s1331_s21, 2 }
  0x41   : > { %s1503_s27 = scalar_select %p27_p6, %s1327_s20, %s29_s14  }
  0x42   : > { %p1497_p5 = por %p1790_p3, %p36_p13  ;;  %p38_p9 = por %p37_p10, %p36_p13 }
  0x43   : > { %s208_s30 = sand.u32 1, %s1327_s20   ;;  %s973_s6 = sshll.u32 %s1331_s21, 12 }
  0x44   : > { %s1791_s23 = scalar_select %p1497_p5, 1, 0 }
  0x45   : > { %s957_s7 = sshll.u32 %s208_s30, 8  ;;  %s1510_s10 = scalar_lea.hbm %s1777_s0, %s973_s6 }
  0x46   : > { %s212_s11 = scalar_lea.vmem [#allocation2], %s957_s7  ;;  %p1514_p11 = pnand %p1133_p7, %p38_p9 }
  0x47   : > { %s220_s28 = sshll.u32 %s212_s11, 4  ;;  %s1518_s13 = scalar_lea.sflag [#allocation3], %s208_s30  ;;  %s1512_s28 = int_to_ptr.vmem [resolvable:$true] %s220_s28 }
  0x48   : > { %s1231_s14 = scalar_lea.hbm %s1510_s10, 4096  ;;  %p1233_p0 = pneg %p1514_p11 }
  0x49   : > { %p1232_p12 = scmp.ne.s32.totalorder %s1510_s10, %s1231_s14  ;;  %s1236_s6 = scalar_lea.hbm %s1777_s0, 8192 }
  0x4a   : > { %p1237_p13 = scmp.lt.u32.totalorder %s1510_s10, %s1777_s0  ;;  %p1238_p6 = scmp.lt.u32.totalorder %s1236_s6, %s1231_s14 }
  0x4b   : > { %p1234_p1 = pnand %p1233_p0, %p1232_p12  ;;  %p1240_p3 = scmp.lt.u32.totalorder %s1231_s14, %s1510_s10 }
  0x4c   : > { %p1239_p10 = por %p1238_p6, %p1237_p13 }
  0x4d   : > { %p1235_p2 = pneg %p1234_p1 }
  0x4e   : > { %p1241_p7 = por %p1240_p3, %p1239_p10 }
  0x50   : > { %p1242_p9 = pnand %p1241_p7, %p1235_p2 }
  0x52   : > { %1245 = shalt.err (!%p1242_p9)
}
  0x53   : > { %s1246_s30 = scalar_lea.vmem %s1512_s28, 4096  ;;  %s1337_s11 = smov [#allocation2]  }
  0x54   : > { %p1247_p12 = scmp.ne.s32.totalorder %s1512_s28, %s1246_s30  ;;  %s1251_s17 = sshll.u32 %s1337_s11, 4  ;;  %s1252_s17 = int_to_ptr.vmem [resolvable:$false] %s1251_s17 }
  0x55   : > { %s1253_s7 = scalar_lea.vmem %s1252_s17, 8192  ;;  %p1254_p4 = scmp.lt.s32.totalorder %s1512_s28, %s1252_s17 }
  0x56   : > { %p1249_p1 = pnand %p1247_p12, %p1233_p0  ;;  %p1255_p13 = scmp.lt.s32.totalorder %s1253_s7, %s1246_s30 }
  0x58   : > { %p1250_p5 = pneg %p1249_p1  ;;  %p1256_p6 = por %p1255_p13, %p1254_p4 }
  0x5a   : > { %p1257_p10 = pnand %p1256_p6, %p1250_p5 }
  0x5c   : > { %1260 = shalt.err (!%p1257_p10)
}
  0x5d   : > { %1126 = dma.hbm_to_vmem [thread:$0]  (!%p1514_p11), %s1510_s10, 4096, %s1512_s28, %s1518_s13, %s1335_s15, %s1335_s15, %s1336_s16  }
  0x5e   : > { %232 = sbr.rel (%p1411_p8) target bundleno = 680 (0x2a8), region = 40  ;;  %s1552_s14 = sand.u32 (!%p1411_p8), 1, %s1323_s19  }
  0x5f   : > { %s962_s6 = sshll.u32 (!%p1411_p8), %s1552_s14, 8  ;;  %s235_s8 = scalar_lea.sflag (!%p1411_p8), [#allocation3], %s1552_s14 }
  0x60   : > { %s1558_s12 = scalar_lea.vmem (!%p1411_p8), [#allocation2], %s962_s6  ;;  %p1793_p4 = scmp.ne.s32.totalorder (!%p1411_p8), %s1786_s24, 0 }
  0x65   : > { %1306 = dma.done.wait (%p1793_p4), %s235_s8, 4096  }
  0x66   : > { %1308 = vsyncadd (%p1793_p4), %s235_s8, 4294963200  ;;  %p1794_p5 = scmp.eq.s32.totalorder %s1392_s22, 0 }
  0x68   : > { %1310 = dma.done.wait (%p1794_p5), [#allocation6], 16384   ;;  %p1795_p8 = pmov %p1794_p5 }
  0x69   : > { %v308_v0 = vld [vmem:[#allocation5 + $0x8] sm:$0xff]  ;;  %v310_v1 = vld [vmem:[#allocation5 + $0x18] sm:$0xff]  ;;  %v307_v2 = vld [vmem:[#allocation5] sm:$0xff]  ;;  %s1662_s10 = scalar_lea.vmem [#allocation8], %s962_s6  ;;  %s975_s28 = sshll.u32 %s1392_s22, 12 }
  0x6a   : > { %1312 = vsyncadd (%p1795_p8), [#allocation6], 4294950912  ;;  %v976_v3 = vpack.c.bf16 %v310_v1, %v308_v0  ;;  %v309_v4 = vld [vmem:[#allocation5 + $0x10] sm:$0xff]  ;;  %v312_v5 = vld [vmem:[#allocation5 + $0x28] sm:$0xff]  ;;  %s860_s13 = sshll.u32 %s1662_s10, 4  ;;  %s1728_s11 = scalar_lea.hbm %s1782_s5, %s975_s28  ;;  %s1730_s13 = int_to_ptr.vmem [resolvable:$true] %s860_s13 }
  0x6b   : > { %v314_v6 = vld [vmem:[#allocation5 + $0x38] sm:$0xff]  ;;  %v978_v7 = vpack.c.bf16 %v309_v4, %v307_v2  ;;  %v311_v9 = vld [vmem:[#allocation5 + $0x20] sm:$0xff]  ;;  %v313_v10 = vld [vmem:[#allocation5 + $0x30] sm:$0xff]  ;;  %s846_s22 = scalar_lea.sflag [#allocation4], %s1552_s14  ;;  %s1261_s17 = scalar_lea.vmem %s1730_s13, 4096 }
  0x6c   : > { %v980_v8 = vpack.c.bf16 %v314_v6, %v312_v5  ;;  %v316_v11 = vld [vmem:[#allocation5 + $0x48] sm:$0xff]  ;;  %977 = vmatprep.subr.bf16.mxu0 %v976_v3  ;;  %v318_v12 = vld [vmem:[#allocation5 + $0x58] sm:$0xff]  ;;  %v982_v13 = vpack.c.bf16 %v313_v10, %v311_v9  ;;  %v315_v15 = vld [vmem:[#allocation5 + $0x40] sm:$0xff]  ;;  %p1262_p11 = scmp.ne.s32.totalorder %s1730_s13, %s1261_s17  ;;  %p1796_p0 = scmp.ne.s32.totalorder %s1791_s23, 0 }
  0x6d   : > { %979 = vmatpush1.bf16.msra.mxu0 %v978_v7  ;;  %v984_v14 = vpack.c.bf16 %v318_v12, %v316_v11  ;;  %v317_v16 = vld [vmem:[#allocation5 + $0x50] sm:$0xff]  ;;  %v320_v17 = vld [vmem:[#allocation5 + $0x68] sm:$0xff]  ;;  %v322_v18 = vld [vmem:[#allocation5 + $0x78] sm:$0xff]  ;;  %s1338_s7 = smov [#allocation8]  }
  0x6e   : > { %981 = vmatprep.subr.bf16.mxu0 %v980_v8  ;;  %v986_v19 = vpack.c.bf16 %v317_v16, %v315_v15  ;;  %v988_v20 = vpack.c.bf16 %v322_v18, %v320_v17  ;;  %v319_v21 = vld [vmem:[#allocation5 + $0x60] sm:$0xff]  ;;  %v321_v22 = vld [vmem:[#allocation5 + $0x70] sm:$0xff]  ;;  %v324_v23 = vld [vmem:[#allocation5 + $0x88] sm:$0xff]  ;;  %p1263_p2 = pnand %p1262_p11, %p1796_p0  ;;  %s1265_s6 = sshll.u32 %s1338_s7, 4  ;;  %s1266_s6 = int_to_ptr.vmem [resolvable:$false] %s1265_s6 }
  0x6f   : > { %v326_v24 = vld [vmem:[#allocation5 + $0x98] sm:$0xff]  ;;  %v990_v25 = vpack.c.bf16 %v321_v22, %v319_v21  ;;  %v323_v27 = vld [vmem:[#allocation5 + $0x80] sm:$0xff]  ;;  %v325_v28 = vld [vmem:[#allocation5 + $0x90] sm:$0xff]  ;;  %s1267_s8 = scalar_lea.vmem %s1266_s6, 8192  ;;  %p1268_p7 = scmp.lt.s32.totalorder %s1730_s13, %s1266_s6 }
  0x70   : > { %v992_v26 = vpack.c.bf16 %v326_v24, %v324_v23  ;;  %v328_v29 = vld [vmem:[#allocation5 + $0xa8] sm:$0xff]  ;;  %v330_v30 = vld [vmem:[#allocation5 + $0xb8] sm:$0xff]  ;;  %v994_v31 = vpack.c.bf16 %v325_v28, %v323_v27  ;;  %v327_v33 = vld [vmem:[#allocation5 + $0xa0] sm:$0xff]  ;;  %p1264_p3 = pneg %p1263_p2  ;;  %p1269_p9 = scmp.lt.s32.totalorder %s1267_s8, %s1261_s17 }
  0x71   : > { %983 = vmatpush1.bf16.msra.mxu0 %v982_v13  ;;  %v996_v32 = vpack.c.bf16 %v330_v30, %v328_v29  ;;  %v329_v34 = vld [vmem:[#allocation5 + $0xb0] sm:$0xff]  ;;  %v332_v35 = vld [vmem:[#allocation5 + $0xc8] sm:$0xff]  ;;  %v334_v36 = vld [vmem:[#allocation5 + $0xd8] sm:$0xff] }
  0x72   : > { %985 = vmatprep.subr.bf16.mxu0 %v984_v14  ;;  %v998_v37 = vpack.c.bf16 %v329_v34, %v327_v33  ;;  %v1000_v38 = vpack.c.bf16 %v334_v36, %v332_v35  ;;  %v331_v39 = vld [vmem:[#allocation5 + $0xc0] sm:$0xff]  ;;  %v333_v40 = vld [vmem:[#allocation5 + $0xd0] sm:$0xff]  ;;  %v276_v41 = vld [vmem:[%s1558_s12 + $0x8] sm:$0xff]  ;;  %p1270_p12 = por %p1269_p9, %p1268_p7 }
  0x73   : > { %v336_v42 = vld [vmem:[#allocation5 + $0xe8] sm:$0xff]  ;;  %v338_v43 = vld [vmem:[#allocation5 + $0xf8] sm:$0xff]  ;;  %447 = vmatprep.mubr.f32.mxu0 %v276_v41  ;;  %v1002_v44 = vpack.c.bf16 %v333_v40, %v331_v39  ;;  %v335_v46 = vld [vmem:[#allocation5 + $0xe0] sm:$0xff] }
  0x74   : > { %v1004_v45 = vpack.c.bf16 %v338_v43, %v336_v42  ;;  %v337_v47 = vld [vmem:[#allocation5 + $0xf0] sm:$0xff]  ;;  %v340_v48 = vld [vmem:[#allocation5 + $0x108] sm:$0xff]  ;;  %v342_v49 = vld [vmem:[#allocation5 + $0x118] sm:$0xff]  ;;  %p1271_p1 = pnand %p1270_p12, %p1264_p3 }
  0x75   : > { %987 = vmatpush1.bf16.msra.mxu0 %v986_v19  ;;  %v1006_v50 = vpack.c.bf16 %v337_v47, %v335_v46  ;;  %v1008_v51 = vpack.c.bf16 %v342_v49, %v340_v48  ;;  %v339_v52 = vld [vmem:[#allocation5 + $0x100] sm:$0xff]  ;;  %v341_v53 = vld [vmem:[#allocation5 + $0x110] sm:$0xff]  ;;  %v344_v54 = vld [vmem:[#allocation5 + $0x128] sm:$0xff] }
  0x76   : > { %989 = vmatprep.subr.bf16.mxu0 %v988_v20  ;;  %v346_v55 = vld [vmem:[#allocation5 + $0x138] sm:$0xff]  ;;  %v343_v56 = vld [vmem:[#allocation5 + $0x120] sm:$0xff]  ;;  %v345_v57 = vld [vmem:[#allocation5 + $0x130] sm:$0xff]  ;;  %v1010_v58 = vpack.c.bf16 %v341_v53, %v339_v52 }
  0x77   : > { %v348_v59 = vld [vmem:[#allocation5 + $0x148] sm:$0xff]  ;;  %v350_v60 = vld [vmem:[#allocation5 + $0x158] sm:$0xff]  ;;  %v576_v63 = vld [vmem:[#allocation7] sm:$0xff]  ;;  %v1012_v0 = vpack.c.bf16 %v346_v55, %v344_v54  ;;  %v1014_v11 = vpack.c.bf16 %v345_v57, %v343_v56 }
  0x78   : > { %v577_v61 = vld [vmem:[#allocation7 + $0x8] sm:$0xff]  ;;  %v579_v62 = vld [vmem:[#allocation7 + $0x18] sm:$0xff]  ;;  %v578_v2 = vld [vmem:[#allocation7 + $0x10] sm:$0xff]  ;;  %v1016_v15 = vpack.c.bf16 %v350_v60, %v348_v59 }
  0x79   : > { %991 = vmatpush1.bf16.msra.mxu0 %v990_v25  ;;  %v1040_v1 = vpack.c.bf16 %v579_v62, %v577_v61  ;;  %v581_v3 = vld [vmem:[#allocation7 + $0x28] sm:$0xff]  ;;  %v583_v4 = vld [vmem:[#allocation7 + $0x38] sm:$0xff]  ;;  %v1042_v5 = vpack.c.bf16 %v578_v2, %v576_v63  ;;  %v580_v7 = vld [vmem:[#allocation7 + $0x20] sm:$0xff] }
  0x7a   : > { %993 = vmatprep.subr.bf16.mxu0 %v992_v26  ;;  %v1044_v6 = vpack.c.bf16 %v583_v4, %v581_v3  ;;  %v582_v8 = vld [vmem:[#allocation7 + $0x30] sm:$0xff]  ;;  %v585_v9 = vld [vmem:[#allocation7 + $0x48] sm:$0xff]  ;;  %v587_v10 = vld [vmem:[#allocation7 + $0x58] sm:$0xff] }
  0x7b   : > { %1041 = vmatprep.subr.bf16.mxu1 %v1040_v1  ;;  %v347_v12 = vld [vmem:[#allocation5 + $0x140] sm:$0xff]  ;;  %v349_v13 = vld [vmem:[#allocation5 + $0x150] sm:$0xff]  ;;  %v1046_v14 = vpack.c.bf16 %v582_v8, %v580_v7  ;;  %v352_v16 = vld [vmem:[#allocation5 + $0x168] sm:$0xff]  ;;  %v1048_v17 = vpack.c.bf16 %v587_v10, %v585_v9 }
  0x7c   : > { %1043 = vmatpush1.bf16.msra.mxu1 %v1042_v5  ;;  %v584_v18 = vld [vmem:[#allocation7 + $0x40] sm:$0xff]  ;;  %v586_v19 = vld [vmem:[#allocation7 + $0x50] sm:$0xff]  ;;  %v354_v20 = vld [vmem:[#allocation5 + $0x178] sm:$0xff]  ;;  %v1018_v23 = vpack.c.bf16 %v349_v13, %v347_v12 }
  0x7d   : > { %995 = vmatpush1.bf16.msra.mxu0 %v994_v31  ;;  %1045 = vmatprep.subr.bf16.mxu1 %v1044_v6  ;;  %v589_v21 = vld [vmem:[#allocation7 + $0x68] sm:$0xff]  ;;  %v591_v22 = vld [vmem:[#allocation7 + $0x78] sm:$0xff]  ;;  %v351_v24 = vld [vmem:[#allocation5 + $0x160] sm:$0xff]  ;;  %v1050_v26 = vpack.c.bf16 %v586_v19, %v584_v18  ;;  %v1020_v27 = vpack.c.bf16 %v354_v20, %v352_v16 }
  0x7e   : > { %997 = vmatprep.subr.bf16.mxu0 %v996_v32  ;;  %v353_v25 = vld [vmem:[#allocation5 + $0x170] sm:$0xff]  ;;  %v356_v28 = vld [vmem:[#allocation5 + $0x188] sm:$0xff]  ;;  %v1052_v29 = vpack.c.bf16 %v591_v22, %v589_v21  ;;  %v588_v30 = vld [vmem:[#allocation7 + $0x60] sm:$0xff] }
  0x7f   : > { %v590_v31 = vld [vmem:[#allocation7 + $0x70] sm:$0xff]  ;;  %v358_v32 = vld [vmem:[#allocation5 + $0x198] sm:$0xff]  ;;  %v593_v33 = vld [vmem:[#allocation7 + $0x88] sm:$0xff]  ;;  %v1022_v35 = vpack.c.bf16 %v353_v25, %v351_v24 }
  0x80   : > { %1047 = vmatpush1.bf16.msra.mxu1 %v1046_v14  ;;  %v595_v34 = vld [vmem:[#allocation7 + $0x98] sm:$0xff]  ;;  %v355_v36 = vld [vmem:[#allocation5 + $0x180] sm:$0xff]  ;;  %v1024_v39 = vpack.c.bf16 %v358_v32, %v356_v28  ;;  %v360_v40 = vld [vmem:[#allocation5 + $0x1a8] sm:$0xff] }
  0x81   : > { %999 = vmatpush1.bf16.msra.mxu0 %v998_v37  ;;  %1049 = vmatprep.subr.bf16.mxu1 %v1048_v17  ;;  %v357_v37 = vld [vmem:[#allocation5 + $0x190] sm:$0xff]  ;;  %v1056_v41 = vpack.c.bf16 %v595_v34, %v593_v33  ;;  %v592_v42 = vld [vmem:[#allocation7 + $0x80] sm:$0xff]  ;;  %v599_v46 = vld [vmem:[#allocation7 + $0xb8] sm:$0xff] }
  0x82   : > { %1001 = vmatprep.subr.bf16.mxu0 %v1000_v38  ;;  %v1054_v38 = vpack.c.bf16 %v590_v31, %v588_v30  ;;  %v594_v43 = vld [vmem:[#allocation7 + $0x90] sm:$0xff]  ;;  %v1026_v47 = vpack.c.bf16 %v357_v37, %v355_v36  ;;  %v359_v48 = vld [vmem:[#allocation5 + $0x1a0] sm:$0xff]  ;;  %v364_v52 = vld [vmem:[#allocation5 + $0x1c8] sm:$0xff] }
  0x83   : > { %v361_v49 = vld [vmem:[#allocation5 + $0x1b0] sm:$0xff]  ;;  %v596_v54 = vld [vmem:[#allocation7 + $0xa0] sm:$0xff]  ;;  %v366_v56 = vld [vmem:[#allocation5 + $0x1d8] sm:$0xff] }
  0x84   : > { %1051 = vmatpush1.bf16.msra.mxu1 %v1050_v26  ;;  %v598_v55 = vld [vmem:[#allocation7 + $0xb0] sm:$0xff]  ;;  %v601_v57 = vld [vmem:[#allocation7 + $0xc8] sm:$0xff]  ;;  %v1030_v59 = vpack.c.bf16 %v361_v49, %v359_v48  ;;  %v363_v60 = vld [vmem:[#allocation5 + $0x1c0] sm:$0xff]  ;;  %v1032_v63 = vpack.c.bf16 %v366_v56, %v364_v52 }
  0x85   : > { %1003 = vmatpush1.bf16.msra.mxu0 %v1002_v44  ;;  %1053 = vmatprep.subr.bf16.mxu1 %v1052_v29  ;;  %v362_v44 = vld [vmem:[#allocation5 + $0x1b8] sm:$0xff]  ;;  %v365_v61 = vld [vmem:[#allocation5 + $0x1d0] sm:$0xff]  ;;  %v1062_v62 = vpack.c.bf16 %v598_v55, %v596_v54  ;;  %v600_v2 = vld [vmem:[#allocation7 + $0xc0] sm:$0xff] }
  0x86   : > { %1005 = vmatprep.subr.bf16.mxu0 %v1004_v45  ;;  %v597_v45 = vld [vmem:[#allocation7 + $0xa8] sm:$0xff]  ;;  %v602_v3 = vld [vmem:[#allocation7 + $0xd0] sm:$0xff]  ;;  %v370_v4 = vld [vmem:[#allocation5 + $0x1f8] sm:$0xff]  ;;  %v1034_v7 = vpack.c.bf16 %v365_v61, %v363_v60 }
  0x87   : > { %v1060_v53 = vpack.c.bf16 %v599_v46, %v597_v45  ;;  %v605_v5 = vld [vmem:[#allocation7 + $0xe8] sm:$0xff]  ;;  %v607_v6 = vld [vmem:[#allocation7 + $0xf8] sm:$0xff]  ;;  %v367_v8 = vld [vmem:[#allocation5 + $0x1e0] sm:$0xff]  ;;  %v1066_v9 = vpack.c.bf16 %v602_v3, %v600_v2 }
  0x88   : > { %1055 = vmatpush1.bf16.msra.mxu1 %v1054_v38  ;;  %v1068_v12 = vpack.c.bf16 %v607_v6, %v605_v5  ;;  %v604_v13 = vld [vmem:[#allocation7 + $0xe0] sm:$0xff]  ;;  %v606_v14 = vld [vmem:[#allocation7 + $0xf0] sm:$0xff]  ;;  %v611_v16 = vld [vmem:[#allocation7 + $0x118] sm:$0xff] }
  0x89   : > { %1007 = vmatpush1.bf16.msra.mxu0 %v1006_v50  ;;  %v1058_v50 = vpack.c.bf16 %v594_v43, %v592_v42  ;;  %1057 = vmatprep.subr.bf16.mxu1 %v1056_v41  ;;  %v1070_v18 = vpack.c.bf16 %v606_v14, %v604_v13  ;;  %v608_v20 = vld [vmem:[#allocation7 + $0x100] sm:$0xff]  ;;  %v610_v21 = vld [vmem:[#allocation7 + $0x110] sm:$0xff]  ;;  %v613_v22 = vld [vmem:[#allocation7 + $0x128] sm:$0xff] }
  0x8a   : > { %1009 = vmatprep.subr.bf16.mxu0 %v1008_v51  ;;  %v1028_v51 = vpack.c.bf16 %v362_v44, %v360_v40  ;;  %v275_v24 = vld [vmem:[%s1558_s12] sm:$0xff]  ;;  %v1074_v25 = vpack.c.bf16 %v610_v21, %v608_v20  ;;  %v278_v26 = vld [vmem:[%s1558_s12 + $0x18] sm:$0xff]  ;;  %v614_v29 = vld [vmem:[#allocation7 + $0x130] sm:$0xff] }
  0x8b   : > { %v612_v28 = vld [vmem:[#allocation7 + $0x120] sm:$0xff]  ;;  %v617_v30 = vld [vmem:[#allocation7 + $0x148] sm:$0xff]  ;;  %v619_v31 = vld [vmem:[#allocation7 + $0x158] sm:$0xff] }
  0x8c   : > { %1059 = vmatpush1.bf16.msra.mxu1 %v1058_v50  ;;  %v277_v32 = vld [vmem:[%s1558_s12 + $0x10] sm:$0xff]  ;;  %v1078_v33 = vpack.c.bf16 %v614_v29, %v612_v28  ;;  %v280_v34 = vld [vmem:[%s1558_s12 + $0x28] sm:$0xff]  ;;  %v616_v36 = vld [vmem:[#allocation7 + $0x140] sm:$0xff] }
  0x8d   : > { %1011 = vmatpush1.bf16.msra.mxu0 %v1010_v58  ;;  %v603_v58 = vld [vmem:[#allocation7 + $0xd8] sm:$0xff]  ;;  %1061 = vmatprep.subr.bf16.mxu1 %v1060_v53  ;;  %v618_v37 = vld [vmem:[#allocation7 + $0x150] sm:$0xff]  ;;  %v621_v38 = vld [vmem:[#allocation7 + $0x168] sm:$0xff] }
  0x8e   : > { %1013 = vmatprep.subr.bf16.mxu0 %v1012_v0  ;;  %v368_v0 = vld [vmem:[#allocation5 + $0x1e8] sm:$0xff]  ;;  %v1064_v1 = vpack.c.bf16 %v603_v58, %v601_v57  ;;  %v279_v40 = vld [vmem:[%s1558_s12 + $0x20] sm:$0xff]  ;;  %v1082_v41 = vpack.c.bf16 %v618_v37, %v616_v36  ;;  %v282_v42 = vld [vmem:[%s1558_s12 + $0x38] sm:$0xff] }
  0x8f   : > { %v1036_v10 = vpack.c.bf16 %v370_v4, %v368_v0  ;;  %v620_v44 = vld [vmem:[#allocation7 + $0x160] sm:$0xff]  ;;  %v622_v45 = vld [vmem:[#allocation7 + $0x170] sm:$0xff]  ;;  %v625_v46 = vld [vmem:[#allocation7 + $0x188] sm:$0xff] }
  0x90   : > { %1063 = vmatpush1.bf16.msra.mxu1 %v1062_v62  ;;  %v281_v48 = vld [vmem:[%s1558_s12 + $0x30] sm:$0xff]  ;;  %v1086_v49 = vpack.c.bf16 %v622_v45, %v620_v44  ;;  %v284_v50 = vld [vmem:[%s1558_s12 + $0x48] sm:$0xff]  ;;  %v624_v52 = vld [vmem:[#allocation7 + $0x180] sm:$0xff] }
  0x91   : > { %1015 = vmatpush1.bf16.msra.mxu0 %v1014_v11  ;;  %v369_v11 = vld [vmem:[#allocation5 + $0x1f0] sm:$0xff]  ;;  %1065 = vmatprep.subr.bf16.mxu1 %v1064_v1  ;;  %v629_v54 = vld [vmem:[#allocation7 + $0x1a8] sm:$0xff]  ;;  %v631_v55 = vld [vmem:[#allocation7 + $0x1b8] sm:$0xff] }
  0x92   : > { %1017 = vmatprep.subr.bf16.mxu0 %v1016_v15  ;;  %v609_v15 = vld [vmem:[#allocation7 + $0x108] sm:$0xff]  ;;  %v1038_v17 = vpack.c.bf16 %v369_v11, %v367_v8  ;;  %v626_v53 = vld [vmem:[#allocation7 + $0x190] sm:$0xff]  ;;  %v283_v56 = vld [vmem:[%s1558_s12 + $0x40] sm:$0xff] }
  0x93   : > { %v1072_v19 = vpack.c.bf16 %v611_v16, %v609_v15  ;;  %v1090_v57 = vpack.c.bf16 %v626_v53, %v624_v52  ;;  %v286_v58 = vld [vmem:[%s1558_s12 + $0x58] sm:$0xff]  ;;  %v628_v60 = vld [vmem:[#allocation7 + $0x1a0] sm:$0xff]  ;;  %v630_v61 = vld [vmem:[#allocation7 + $0x1b0] sm:$0xff] }
  0x94   : > { %1067 = vmatpush1.bf16.msra.mxu1 %v1066_v9  ;;  %v633_v62 = vld [vmem:[#allocation7 + $0x1c8] sm:$0xff]  ;;  %v285_v0 = vld [vmem:[%s1558_s12 + $0x50] sm:$0xff]  ;;  %v1094_v1 = vpack.c.bf16 %v630_v61, %v628_v60  ;;  %v287_v4 = vld [vmem:[%s1558_s12 + $0x60] sm:$0xff] }
  0x95   : > { %1019 = vmatpush1.bf16.msra.mxu0 %v1018_v23  ;;  %1069 = vmatprep.subr.bf16.mxu1 %v1068_v12  ;;  %v615_v23 = vld [vmem:[#allocation7 + $0x138] sm:$0xff]  ;;  %v288_v2 = vld [vmem:[%s1558_s12 + $0x68] sm:$0xff]  ;;  %v289_v6 = vld [vmem:[%s1558_s12 + $0x70] sm:$0xff] }
  0x96   : > { %1021 = vmatprep.subr.bf16.mxu0 %v1020_v27  ;;  %v1076_v27 = vpack.c.bf16 %v615_v23, %v613_v22  ;;  %v290_v5 = vld [vmem:[%s1558_s12 + $0x78] sm:$0xff]  ;;  %v291_v8 = vld [vmem:[%s1558_s12 + $0x80] sm:$0xff]  ;;  %v296_v11 = vld [vmem:[%s1558_s12 + $0xa8] sm:$0xff] }
  0x97   : > { %v294_v9 = vld [vmem:[%s1558_s12 + $0x98] sm:$0xff]  ;;  %v295_v12 = vld [vmem:[%s1558_s12 + $0xa0] sm:$0xff]  ;;  %v297_v14 = vld [vmem:[%s1558_s12 + $0xb0] sm:$0xff] }
  0x98   : > { %1071 = vmatpush1.bf16.msra.mxu1 %v1070_v18  ;;  %v298_v13 = vld [vmem:[%s1558_s12 + $0xb8] sm:$0xff]  ;;  %v300_v15 = vld [vmem:[%s1558_s12 + $0xc8] sm:$0xff]  ;;  %v299_v16 = vld [vmem:[%s1558_s12 + $0xc0] sm:$0xff] }
  0x99   : > { %1023 = vmatpush1.bf16.msra.mxu0 %v1022_v35  ;;  %1073 = vmatprep.subr.bf16.mxu1 %v1072_v19  ;;  %v1080_v35 = vpack.c.bf16 %v619_v31, %v617_v30  ;;  %v301_v18 = vld [vmem:[%s1558_s12 + $0xd0] sm:$0xff]  ;;  %v304_v19 = vld [vmem:[%s1558_s12 + $0xe8] sm:$0xff]  ;;  %v303_v20 = vld [vmem:[%s1558_s12 + $0xe0] sm:$0xff] }
  0x9a   : > { %1025 = vmatprep.subr.bf16.mxu0 %v1024_v39  ;;  %v623_v39 = vld [vmem:[#allocation7 + $0x178] sm:$0xff]  ;;  %v305_v22 = vld [vmem:[%s1558_s12 + $0xf0] sm:$0xff]  ;;  %v632_v23 = vld [vmem:[#allocation7 + $0x1c0] sm:$0xff] }
  0x9b   : > { %v1084_v43 = vpack.c.bf16 %v623_v39, %v621_v38  ;;  %v306_v21 = vld [vmem:[%s1558_s12 + $0xf8] sm:$0xff]  ;;  %v636_v29 = vld [vmem:[#allocation7 + $0x1e0] sm:$0xff]  ;;  %v638_v30 = vld [vmem:[#allocation7 + $0x1f0] sm:$0xff] }
  0x9c   : > { %1075 = vmatpush1.bf16.msra.mxu1 %v1074_v25  ;;  %v1102_v31 = vpack.c.bf16 %v638_v30, %v636_v29 }
  0x9d   : > { %1027 = vmatpush1.bf16.msra.mxu0 %v1026_v47  ;;  %1077 = vmatprep.subr.bf16.mxu1 %v1076_v27  ;;  %v627_v47 = vld [vmem:[#allocation7 + $0x198] sm:$0xff] }
  0x9e   : > { %1029 = vmatprep.subr.bf16.mxu0 %v1028_v51  ;;  %v1088_v51 = vpack.c.bf16 %v627_v47, %v625_v46  ;;  %v639_v27 = vld [vmem:[#allocation7 + $0x1f8] sm:$0xff] }
  0xa0   : > { %1079 = vmatpush1.bf16.msra.mxu1 %v1078_v33 }
  0xa1   : > { %1031 = vmatpush1.bf16.msra.mxu0 %v1030_v59  ;;  %1081 = vmatprep.subr.bf16.mxu1 %v1080_v35  ;;  %v1092_v59 = vpack.c.bf16 %v631_v55, %v629_v54  ;;  %v371_v35 = vld [vmem:[%s1779_s2] sm:$0x3] }
  0xa2   : > { %1033 = vmatprep.subr.bf16.mxu0 %v1032_v63  ;;  %v635_v63 = vld [vmem:[#allocation7 + $0x1d8] sm:$0xff] }
  0xa3   : > { %v1096_v3 = vpack.c.bf16 %v635_v63, %v633_v62 }
  0xa4   : > { %1083 = vmatpush1.bf16.msra.mxu1 %v1082_v41 }
  0xa5   : > { %1035 = vmatpush1.bf16.msra.mxu0 %v1034_v7  ;;  %1085 = vmatprep.subr.bf16.mxu1 %v1084_v43  ;;  %v292_v7 = vld [vmem:[%s1558_s12 + $0x88] sm:$0xff] }
  0xa6   : > { %1037 = vmatprep.subr.bf16.mxu0 %v1036_v10  ;;  %v293_v10 = vld [vmem:[%s1558_s12 + $0x90] sm:$0xff] }
  0xa8   : > { %1087 = vmatpush1.bf16.msra.mxu1 %v1086_v49 }
  0xa9   : > { %1039 = vmatpush1.bf16.msra.mxu0 %v1038_v17  ;;  %1089 = vmatprep.subr.bf16.mxu1 %v1088_v51  ;;  %v302_v17 = vld [vmem:[%s1558_s12 + $0xd8] sm:$0xff] }
  0xac   : > { %448 = vmatmul.mubr.f32.vlgmr.msra.gmra.mrb[0].mxu0 %v275_v24  ;;  %1091 = vmatpush1.bf16.msra.mxu1 %v1090_v57  ;;  %v634_v24 = vld [vmem:[#allocation7 + $0x1d0] sm:$0xff] }
  0xad   : > { %453 = vmatprep.mubr.f32.mxu0 %v278_v26  ;;  %1093 = vmatprep.subr.bf16.mxu1 %v1092_v59  ;;  %v1098_v25 = vpack.c.bf16 %v634_v24, %v632_v23  ;;  %v637_v26 = vld [vmem:[#allocation7 + $0x1e8] sm:$0xff] }
  0xae   : > { %v1100_v28 = vpack.c.bf16 %v639_v27, %v637_v26 }
  0xb0   : > { %454 = vmatmul.mubr.f32.gmra.mrb[2].mxu0 %v277_v32  ;;  %1095 = vmatpush1.bf16.msra.mxu1 %v1094_v1  ;;  %v373_v32 = vlaneseq }
  0xb1   : > { %459 = vmatprep.mubr.f32.mxu0 %v280_v34  ;;  %1097 = vmatprep.subr.bf16.mxu1 %v1096_v3 }
  0xb2   : > { %v1600_v33 = vshrl.u32 %v373_v32, 7 }
  0xb4   : > { %460 = vmatmul.mubr.f32.gmra.mrb[4].mxu0 %v279_v40  ;;  %1099 = vmatpush1.bf16.msra.mxu1 %v1098_v25  ;;  %v375_v34 = vsub.s32 0, %v1600_v33  ;;  %v379_v36 = vsub.s32 1, %v1600_v33 }
  0xb5   : > { %465 = vmatprep.mubr.f32.mxu0 %v282_v42  ;;  %1101 = vmatprep.subr.bf16.mxu1 %v1100_v28 }
  0xb6   : > { %v1609_v37 = vrot.slane %v371_v35, %v375_v34  ;;  %v1613_v38 = vrot.slane %v371_v35, %v379_v36 }
  0xb8   : > { %466 = vmatmul.mubr.f32.gmra.mrb[6].mxu0 %v281_v48  ;;  %1103 = vmatpush1.bf16.msra.mxu1 %v1102_v31 }
  0xb9   : > { %471 = vmatprep.mubr.f32.mxu0 %v284_v50 }
  0xbc   : > { %472 = vmatmul.mubr.f32.gmra.mrb[8].mxu0 %v283_v56 }
  0xbd   : > { %477 = vmatprep.mubr.f32.mxu0 %v286_v58 }
  0xc0   : > { %478 = vmatmul.mubr.f32.gmra.mrb[10].mxu0 %v285_v0 }
  0xc1   : > { %483 = vmatprep.mubr.f32.mxu0 %v288_v2 }
  0xc4   : > { %484 = vmatmul.mubr.f32.gmra.mrb[12].mxu0 %v287_v4 }
  0xc5   : > { %489 = vmatprep.mubr.f32.mxu0 %v290_v5 }
  0xc8   : > { %490 = vmatmul.mubr.f32.gmra.mrb[14].mxu0 %v289_v6 }
  0xc9   : > { %495 = vmatprep.mubr.f32.mxu0 %v292_v7 }
  0xcc   : > { %496 = vmatmul.mubr.f32.gmra.mrb[16].mxu0 %v291_v8 }
  0xcd   : > { %501 = vmatprep.mubr.f32.mxu0 %v294_v9 }
  0xd0   : > { %502 = vmatmul.mubr.f32.gmra.mrb[18].mxu0 %v293_v10 }
  0xd1   : > { %507 = vmatprep.mubr.f32.mxu0 %v296_v11 }
  0xd4   : > { %508 = vmatmul.mubr.f32.gmra.mrb[20].mxu0 %v295_v12 }
  0xd5   : > { %513 = vmatprep.mubr.f32.mxu0 %v298_v13 }
  0xd8   : > { %514 = vmatmul.mubr.f32.gmra.mrb[22].mxu0 %v297_v14 }
  0xd9   : > { %519 = vmatprep.mubr.f32.mxu0 %v300_v15 }
  0xdc   : > { %520 = vmatmul.mubr.f32.gmra.mrb[24].mxu0 %v299_v16 }
  0xdd   : > { %525 = vmatprep.mubr.f32.mxu0 %v302_v17 }
  0xe0   : > { %526 = vmatmul.mubr.f32.gmra.mrb[26].mxu0 %v301_v18 }
  0xe1   : > { %531 = vmatprep.mubr.f32.mxu0 %v304_v19 }
  0xe4   : > { %532 = vmatmul.mubr.f32.gmra.mrb[28].mxu0 %v303_v20 }
  0xe5   : > { %537 = vmatprep.mubr.f32.mxu0 %v306_v21 }
  0xe8   : > { %538 = vmatmul.mubr.f32.gmra.mrb[30].mxu0 %v305_v22 }
 0x17f   : > { %v449_v39 = vpop.f32.mrb[0].mxu0 }
 0x180   : > { %v450_v40 = vadd.f32 %v449_v39, %v1609_v37  ;;  %v451_v41 = vpop.f32.mrb[1].mxu0 }
 0x181   : > { %v452_v42 = vadd.f32 %v451_v41, %v1613_v38 }
 0x182   : > { %v544_v45 = vmax.f32 %v450_v40, 0.0 }
 0x183   : > { %v455_v43 = vpop.f32.mrb[2].mxu0  ;;  %v545_v44 = vmax.f32 %v452_v42, 0.0 }
 0x184   : > { %v456_v46 = vadd.f32 %v455_v43, %v1609_v37  ;;  %v457_v47 = vpop.f32.mrb[3].mxu0 }
 0x185   : > { %v458_v48 = vadd.f32 %v457_v47, %v1613_v38  ;;  %716 = vmatprep.mubr.f32.mxu1 %v545_v44 }
 0x186   : > { %717 = vmatmul.mubr.f32.vlgmr.msra.gmra.mrb[0].mxu1 %v544_v45  ;;  %v546_v51 = vmax.f32 %v456_v46, 0.0 }
 0x187   : > { %v547_v49 = vmax.f32 %v458_v48, 0.0  ;;  %v461_v50 = vpop.f32.mrb[4].mxu0 }
 0x188   : > { %v462_v52 = vadd.f32 %v461_v50, %v1609_v37  ;;  %v463_v53 = vpop.f32.mrb[5].mxu0 }
 0x189   : > { %v464_v54 = vadd.f32 %v463_v53, %v1613_v38  ;;  %722 = vmatprep.mubr.f32.mxu1 %v547_v49 }
 0x18a   : > { %723 = vmatmul.mubr.f32.gmra.mrb[2].mxu1 %v546_v51  ;;  %v548_v57 = vmax.f32 %v462_v52, 0.0 }
 0x18b   : > { %v549_v55 = vmax.f32 %v464_v54, 0.0  ;;  %v467_v56 = vpop.f32.mrb[6].mxu0 }
 0x18c   : > { %v468_v58 = vadd.f32 %v467_v56, %v1609_v37  ;;  %v469_v59 = vpop.f32.mrb[7].mxu0 }
 0x18d   : > { %v470_v60 = vadd.f32 %v469_v59, %v1613_v38  ;;  %728 = vmatprep.mubr.f32.mxu1 %v549_v55 }
 0x18e   : > { %729 = vmatmul.mubr.f32.gmra.mrb[4].mxu1 %v548_v57  ;;  %v550_v63 = vmax.f32 %v468_v58, 0.0 }
 0x18f   : > { %v551_v61 = vmax.f32 %v470_v60, 0.0  ;;  %v473_v62 = vpop.f32.mrb[8].mxu0 }
 0x190   : > { %v474_v0 = vadd.f32 %v473_v62, %v1609_v37  ;;  %v475_v1 = vpop.f32.mrb[9].mxu0 }
 0x191   : > { %v476_v2 = vadd.f32 %v475_v1, %v1613_v38  ;;  %734 = vmatprep.mubr.f32.mxu1 %v551_v61 }
 0x192   : > { %735 = vmatmul.mubr.f32.gmra.mrb[6].mxu1 %v550_v63  ;;  %v552_v5 = vmax.f32 %v474_v0, 0.0 }
 0x193   : > { %v553_v3 = vmax.f32 %v476_v2, 0.0  ;;  %v479_v4 = vpop.f32.mrb[10].mxu0 }
 0x194   : > { %v480_v6 = vadd.f32 %v479_v4, %v1609_v37  ;;  %v481_v7 = vpop.f32.mrb[11].mxu0 }
 0x195   : > { %v482_v8 = vadd.f32 %v481_v7, %v1613_v38  ;;  %740 = vmatprep.mubr.f32.mxu1 %v553_v3 }
 0x196   : > { %741 = vmatmul.mubr.f32.gmra.mrb[8].mxu1 %v552_v5  ;;  %v554_v11 = vmax.f32 %v480_v6, 0.0 }
 0x197   : > { %v555_v9 = vmax.f32 %v482_v8, 0.0  ;;  %v485_v10 = vpop.f32.mrb[12].mxu0 }
 0x198   : > { %v486_v12 = vadd.f32 %v485_v10, %v1609_v37  ;;  %v487_v13 = vpop.f32.mrb[13].mxu0 }
 0x199   : > { %v488_v14 = vadd.f32 %v487_v13, %v1613_v38  ;;  %746 = vmatprep.mubr.f32.mxu1 %v555_v9 }
 0x19a   : > { %747 = vmatmul.mubr.f32.gmra.mrb[10].mxu1 %v554_v11  ;;  %v556_v17 = vmax.f32 %v486_v12, 0.0  ;;  %v640_v12 = vld [vmem:[%s1781_s4] sm:$0x3] }
 0x19b   : > { %v557_v15 = vmax.f32 %v488_v14, 0.0  ;;  %v491_v16 = vpop.f32.mrb[14].mxu0  ;;  %v1652_v13 = vrot.slane %v640_v12, %v375_v34 }
 0x19c   : > { %v492_v18 = vadd.f32 %v491_v16, %v1609_v37  ;;  %v493_v19 = vpop.f32.mrb[15].mxu0 }
 0x19d   : > { %v494_v20 = vadd.f32 %v493_v19, %v1613_v38  ;;  %752 = vmatprep.mubr.f32.mxu1 %v557_v15 }
 0x19e   : > { %753 = vmatmul.mubr.f32.gmra.mrb[12].mxu1 %v556_v17  ;;  %v558_v23 = vmax.f32 %v492_v18, 0.0 }
 0x19f   : > { %v559_v21 = vmax.f32 %v494_v20, 0.0  ;;  %v497_v22 = vpop.f32.mrb[16].mxu0 }
 0x1a0   : > { %v498_v24 = vadd.f32 %v497_v22, %v1609_v37  ;;  %v499_v25 = vpop.f32.mrb[17].mxu0 }
 0x1a1   : > { %v500_v26 = vadd.f32 %v499_v25, %v1613_v38  ;;  %758 = vmatprep.mubr.f32.mxu1 %v559_v21 }
 0x1a2   : > { %759 = vmatmul.mubr.f32.gmra.mrb[14].mxu1 %v558_v23  ;;  %v560_v29 = vmax.f32 %v498_v24, 0.0 }
 0x1a3   : > { %v561_v27 = vmax.f32 %v500_v26, 0.0  ;;  %v503_v28 = vpop.f32.mrb[18].mxu0 }
 0x1a4   : > { %v504_v30 = vadd.f32 %v503_v28, %v1609_v37  ;;  %v505_v31 = vpop.f32.mrb[19].mxu0 }
 0x1a5   : > { %v506_v32 = vadd.f32 %v505_v31, %v1613_v38  ;;  %764 = vmatprep.mubr.f32.mxu1 %v561_v27 }
 0x1a6   : > { %765 = vmatmul.mubr.f32.gmra.mrb[16].mxu1 %v560_v29  ;;  %v562_v40 = vmax.f32 %v504_v30, 0.0 }
 0x1a7   : > { %v563_v35 = vmax.f32 %v506_v32, 0.0  ;;  %v509_v39 = vpop.f32.mrb[20].mxu0 }
 0x1a8   : > { %v510_v41 = vadd.f32 %v509_v39, %v1609_v37  ;;  %v511_v42 = vpop.f32.mrb[21].mxu0 }
 0x1a9   : > { %v512_v43 = vadd.f32 %v511_v42, %v1613_v38  ;;  %770 = vmatprep.mubr.f32.mxu1 %v563_v35 }
 0x1aa   : > { %771 = vmatmul.mubr.f32.gmra.mrb[18].mxu1 %v562_v40  ;;  %v564_v46 = vmax.f32 %v510_v41, 0.0 }
 0x1ab   : > { %v565_v44 = vmax.f32 %v512_v43, 0.0  ;;  %v515_v45 = vpop.f32.mrb[22].mxu0 }
 0x1ac   : > { %v516_v47 = vadd.f32 %v515_v45, %v1609_v37  ;;  %v517_v48 = vpop.f32.mrb[23].mxu0 }
 0x1ad   : > { %v518_v49 = vadd.f32 %v517_v48, %v1613_v38  ;;  %776 = vmatprep.mubr.f32.mxu1 %v565_v44 }
 0x1ae   : > { %777 = vmatmul.mubr.f32.gmra.mrb[20].mxu1 %v564_v46  ;;  %v566_v52 = vmax.f32 %v516_v47, 0.0 }
 0x1af   : > { %v567_v50 = vmax.f32 %v518_v49, 0.0  ;;  %v521_v51 = vpop.f32.mrb[24].mxu0 }
 0x1b0   : > { %v522_v53 = vadd.f32 %v521_v51, %v1609_v37  ;;  %v523_v54 = vpop.f32.mrb[25].mxu0 }
 0x1b1   : > { %v524_v55 = vadd.f32 %v523_v54, %v1613_v38  ;;  %782 = vmatprep.mubr.f32.mxu1 %v567_v50 }
 0x1b2   : > { %783 = vmatmul.mubr.f32.gmra.mrb[22].mxu1 %v566_v52  ;;  %v568_v58 = vmax.f32 %v522_v53, 0.0 }
 0x1b3   : > { %v569_v56 = vmax.f32 %v524_v55, 0.0  ;;  %v527_v57 = vpop.f32.mrb[26].mxu0 }
 0x1b4   : > { %v528_v59 = vadd.f32 %v527_v57, %v1609_v37  ;;  %v529_v60 = vpop.f32.mrb[27].mxu0 }
 0x1b5   : > { %v530_v61 = vadd.f32 %v529_v60, %v1613_v38  ;;  %788 = vmatprep.mubr.f32.mxu1 %v569_v56 }
 0x1b6   : > { %789 = vmatmul.mubr.f32.gmra.mrb[24].mxu1 %v568_v58  ;;  %v570_v0 = vmax.f32 %v528_v59, 0.0 }
 0x1b7   : > { %v571_v62 = vmax.f32 %v530_v61, 0.0  ;;  %v533_v63 = vpop.f32.mrb[28].mxu0 }
 0x1b8   : > { %v534_v1 = vadd.f32 %v533_v63, %v1609_v37  ;;  %v535_v2 = vpop.f32.mrb[29].mxu0 }
 0x1b9   : > { %v536_v3 = vadd.f32 %v535_v2, %v1613_v38  ;;  %794 = vmatprep.mubr.f32.mxu1 %v571_v62 }
 0x1ba   : > { %795 = vmatmul.mubr.f32.gmra.mrb[26].mxu1 %v570_v0  ;;  %v572_v6 = vmax.f32 %v534_v1, 0.0 }
 0x1bb   : > { %v573_v4 = vmax.f32 %v536_v3, 0.0  ;;  %v539_v5 = vpop.f32.mrb[30].mxu0 }
 0x1bc   : > { %v540_v7 = vadd.f32 %v539_v5, %v1609_v37  ;;  %v541_v8 = vpop.f32.mrb[31].mxu0  ;;  %v1656_v37 = vrot.slane %v640_v12, %v379_v36 }
 0x1bd   : > { %v542_v9 = vadd.f32 %v541_v8, %v1613_v38  ;;  %800 = vmatprep.mubr.f32.mxu1 %v573_v4 }
 0x1be   : > { %801 = vmatmul.mubr.f32.gmra.mrb[28].mxu1 %v572_v6  ;;  %v574_v11 = vmax.f32 %v540_v7, 0.0 }
 0x1bf   : > { %v575_v10 = vmax.f32 %v542_v9, 0.0 }
 0x1c1   : > { %806 = vmatprep.mubr.f32.mxu1 %v575_v10 }
 0x1c2   : > { %807 = vmatmul.mubr.f32.gmra.mrb[30].mxu1 %v574_v11 }
 0x259   : > { %v718_v14 = vpop.f32.mrb[0].mxu1 }
 0x25a   : > { %v719_v38 = vadd.f32 %v718_v14, %v1652_v13  ;;  %v720_v15 = vpop.f32.mrb[1].mxu1 }
 0x25b   : > { %v721_v16 = vadd.f32 %v720_v15, %v1656_v37 }
 0x25c   : > { %813 = vst [vmem:[%s1662_s10] sm:$0xff] %v719_v38 }
 0x25d   : > { %814 = vst [vmem:[%s1662_s10 + $0x8] sm:$0xff] %v721_v16  ;;  %v724_v33 = vpop.f32.mrb[2].mxu1 }
 0x25e   : > { %v725_v34 = vadd.f32 %v724_v33, %v1652_v13  ;;  %v726_v36 = vpop.f32.mrb[3].mxu1 }
 0x25f   : > { %v727_v17 = vadd.f32 %v726_v36, %v1656_v37 }
 0x260   : > { %815 = vst [vmem:[%s1662_s10 + $0x10] sm:$0xff] %v725_v34 }
 0x261   : > { %816 = vst [vmem:[%s1662_s10 + $0x18] sm:$0xff] %v727_v17  ;;  %v730_v18 = vpop.f32.mrb[4].mxu1 }
 0x262   : > { %v731_v19 = vadd.f32 %v730_v18, %v1652_v13  ;;  %v732_v20 = vpop.f32.mrb[5].mxu1 }
 0x263   : > { %v733_v21 = vadd.f32 %v732_v20, %v1656_v37 }
 0x264   : > { %817 = vst [vmem:[%s1662_s10 + $0x20] sm:$0xff] %v731_v19 }
 0x265   : > { %818 = vst [vmem:[%s1662_s10 + $0x28] sm:$0xff] %v733_v21  ;;  %v736_v22 = vpop.f32.mrb[6].mxu1 }
 0x266   : > { %v737_v23 = vadd.f32 %v736_v22, %v1652_v13  ;;  %v738_v24 = vpop.f32.mrb[7].mxu1 }
 0x267   : > { %v739_v25 = vadd.f32 %v738_v24, %v1656_v37 }
 0x268   : > { %819 = vst [vmem:[%s1662_s10 + $0x30] sm:$0xff] %v737_v23 }
 0x269   : > { %820 = vst [vmem:[%s1662_s10 + $0x38] sm:$0xff] %v739_v25  ;;  %v742_v26 = vpop.f32.mrb[8].mxu1 }
 0x26a   : > { %v743_v27 = vadd.f32 %v742_v26, %v1652_v13  ;;  %v744_v28 = vpop.f32.mrb[9].mxu1 }
 0x26b   : > { %v745_v29 = vadd.f32 %v744_v28, %v1656_v37 }
 0x26c   : > { %821 = vst [vmem:[%s1662_s10 + $0x40] sm:$0xff] %v743_v27 }
 0x26d   : > { %822 = vst [vmem:[%s1662_s10 + $0x48] sm:$0xff] %v745_v29  ;;  %v748_v30 = vpop.f32.mrb[10].mxu1 }
 0x26e   : > { %v749_v31 = vadd.f32 %v748_v30, %v1652_v13  ;;  %v750_v32 = vpop.f32.mrb[11].mxu1 }
 0x26f   : > { %v751_v35 = vadd.f32 %v750_v32, %v1656_v37 }
 0x270   : > { %823 = vst [vmem:[%s1662_s10 + $0x50] sm:$0xff] %v749_v31 }
 0x271   : > { %824 = vst [vmem:[%s1662_s10 + $0x58] sm:$0xff] %v751_v35  ;;  %v754_v39 = vpop.f32.mrb[12].mxu1 }
 0x272   : > { %v755_v40 = vadd.f32 %v754_v39, %v1652_v13  ;;  %v756_v41 = vpop.f32.mrb[13].mxu1 }
 0x273   : > { %v757_v42 = vadd.f32 %v756_v41, %v1656_v37 }
 0x274   : > { %825 = vst [vmem:[%s1662_s10 + $0x60] sm:$0xff] %v755_v40 }
 0x275   : > { %826 = vst [vmem:[%s1662_s10 + $0x68] sm:$0xff] %v757_v42  ;;  %v760_v43 = vpop.f32.mrb[14].mxu1 }
 0x276   : > { %v761_v44 = vadd.f32 %v760_v43, %v1652_v13  ;;  %v762_v45 = vpop.f32.mrb[15].mxu1 }
 0x277   : > { %v763_v46 = vadd.f32 %v762_v45, %v1656_v37 }
 0x278   : > { %827 = vst [vmem:[%s1662_s10 + $0x70] sm:$0xff] %v761_v44 }
 0x279   : > { %828 = vst [vmem:[%s1662_s10 + $0x78] sm:$0xff] %v763_v46  ;;  %v766_v47 = vpop.f32.mrb[16].mxu1 }
 0x27a   : > { %v767_v48 = vadd.f32 %v766_v47, %v1652_v13  ;;  %v768_v49 = vpop.f32.mrb[17].mxu1 }
 0x27b   : > { %v769_v50 = vadd.f32 %v768_v49, %v1656_v37 }
 0x27c   : > { %829 = vst [vmem:[%s1662_s10 + $0x80] sm:$0xff] %v767_v48 }
 0x27d   : > { %830 = vst [vmem:[%s1662_s10 + $0x88] sm:$0xff] %v769_v50  ;;  %v772_v51 = vpop.f32.mrb[18].mxu1 }
 0x27e   : > { %v773_v52 = vadd.f32 %v772_v51, %v1652_v13  ;;  %v774_v53 = vpop.f32.mrb[19].mxu1 }
 0x27f   : > { %v775_v54 = vadd.f32 %v774_v53, %v1656_v37 }
 0x280   : > { %831 = vst [vmem:[%s1662_s10 + $0x90] sm:$0xff] %v773_v52 }
 0x281   : > { %832 = vst [vmem:[%s1662_s10 + $0x98] sm:$0xff] %v775_v54  ;;  %v778_v55 = vpop.f32.mrb[20].mxu1 }
 0x282   : > { %v779_v56 = vadd.f32 %v778_v55, %v1652_v13  ;;  %v780_v57 = vpop.f32.mrb[21].mxu1 }
 0x283   : > { %v781_v58 = vadd.f32 %v780_v57, %v1656_v37 }
 0x284   : > { %833 = vst [vmem:[%s1662_s10 + $0xa0] sm:$0xff] %v779_v56 }
 0x285   : > { %834 = vst [vmem:[%s1662_s10 + $0xa8] sm:$0xff] %v781_v58  ;;  %v784_v59 = vpop.f32.mrb[22].mxu1 }
 0x286   : > { %v785_v60 = vadd.f32 %v784_v59, %v1652_v13  ;;  %v786_v61 = vpop.f32.mrb[23].mxu1 }
 0x287   : > { %v787_v62 = vadd.f32 %v786_v61, %v1656_v37 }
 0x288   : > { %835 = vst [vmem:[%s1662_s10 + $0xb0] sm:$0xff] %v785_v60 }
 0x289   : > { %836 = vst [vmem:[%s1662_s10 + $0xb8] sm:$0xff] %v787_v62  ;;  %v790_v63 = vpop.f32.mrb[24].mxu1 }
 0x28a   : > { %v791_v0 = vadd.f32 %v790_v63, %v1652_v13  ;;  %v792_v1 = vpop.f32.mrb[25].mxu1 }
 0x28b   : > { %v793_v2 = vadd.f32 %v792_v1, %v1656_v37 }
 0x28c   : > { %837 = vst [vmem:[%s1662_s10 + $0xc0] sm:$0xff] %v791_v0 }
 0x28d   : > { %838 = vst [vmem:[%s1662_s10 + $0xc8] sm:$0xff] %v793_v2  ;;  %v796_v3 = vpop.f32.mrb[26].mxu1 }
 0x28e   : > { %v797_v4 = vadd.f32 %v796_v3, %v1652_v13  ;;  %v798_v5 = vpop.f32.mrb[27].mxu1 }
 0x28f   : > { %v799_v6 = vadd.f32 %v798_v5, %v1656_v37 }
 0x290   : > { %839 = vst [vmem:[%s1662_s10 + $0xd0] sm:$0xff] %v797_v4 }
 0x291   : > { %840 = vst [vmem:[%s1662_s10 + $0xd8] sm:$0xff] %v799_v6  ;;  %v802_v7 = vpop.f32.mrb[28].mxu1 }
 0x292   : > { %v803_v8 = vadd.f32 %v802_v7, %v1652_v13  ;;  %v804_v9 = vpop.f32.mrb[29].mxu1 }
 0x293   : > { %v805_v10 = vadd.f32 %v804_v9, %v1656_v37 }
 0x294   : > { %841 = vst [vmem:[%s1662_s10 + $0xe0] sm:$0xff] %v803_v8 }
 0x295   : > { %842 = vst [vmem:[%s1662_s10 + $0xe8] sm:$0xff] %v805_v10  ;;  %v808_v11 = vpop.f32.mrb[30].mxu1 }
 0x296   : > { %v809_v12 = vadd.f32 %v808_v11, %v1652_v13  ;;  %v810_v14 = vpop.f32.mrb[31].mxu1 }
 0x297   : > { %v811_v38 = vadd.f32 %v810_v14, %v1656_v37 }
 0x298   : > { %843 = vst [vmem:[%s1662_s10 + $0xf0] sm:$0xff] %v809_v12 }
 0x299   : > { %844 = vst [vmem:[%s1662_s10 + $0xf8] sm:$0xff] %v811_v38 }
 0x29a   : > { %1274 = shalt.err (!%p1271_p1)
}
 0x29b   : > { %s1275_s12 = scalar_lea.hbm %s1728_s11, 4096  ;;  %s1279_s15 = scalar_lea.hbm %s1782_s5, 8192 }
 0x29c   : > { %p1276_p13 = scmp.ne.s32.totalorder %s1728_s11, %s1275_s12  ;;  %p1280_p4 = scmp.lt.u32.totalorder %s1728_s11, %s1782_s5 }
 0x29d   : > { %p1281_p5 = scmp.lt.u32.totalorder %s1279_s15, %s1275_s12  ;;  %p1283_p11 = scmp.lt.u32.totalorder %s1275_s12, %s1728_s11 }
 0x29e   : > { %p1277_p6 = pnand %p1276_p13, %p1796_p0 }
 0x29f   : > { %p1282_p8 = por %p1281_p5, %p1280_p4 }
 0x2a0   : > { %p1278_p10 = pneg %p1277_p6 }
 0x2a1   : > { %p1284_p2 = por %p1283_p11, %p1282_p8 }
 0x2a3   : > { %p1285_p3 = pnand %p1284_p2, %p1278_p10 }
 0x2a5   : > { %1288 = shalt.err (!%p1285_p3)
}
 0x2a6   : > { %s1339_s28 = smov 256   ;;  %s1340_s9 = smov 16  }
 0x2a7   : > { %1114 = dma.vmem_to_hbm [thread:$0]  (%p1796_p0), %s1730_s13, 4096, %s1728_s11, %s846_s22, %s1339_s28, %s1339_s28, %s1340_s9  }
 0x2a8 PF: > { %s875_s30 = sand.u32 1, %s1319_s18   ;;  %p1797_p7 = scmp.ne.s32.totalorder %s1787_s25, 0 }
 0x2a9   : > { %p1798_p9 = scmp.ge.s32.totalorder %s1331_s21, 2  ;;  %s876_s17 = scalar_lea.sflag [#allocation4], %s875_s30 }
 0x2ab   : > { %p1128_p12 = pnand %p1798_p9, %p1797_p7 }
 0x2ad   : > { %1314 = dma.done.wait (!%p1128_p12), %s876_s17, 4096  }
 0x2ae   : > { %1316 = vsyncadd (!%p1128_p12), %s876_s17, 4294963200  ;;  %p19_p1 = scmp.ge.s32.totalorder %s1487_s29, 4   ;;  %s1799_s18 = smov %s1323_s19 }
 0x2af   : > { %s1800_s19 = smov %s1327_s20  ;;  %s1801_s20 = smov %s1503_s27 }
 0x2b0   : > { %s1802_s21 = smov %s1487_s29  ;;  %21 = sbr.rel (!%p19_p1) target bundleno = 6 (0x6), region = 93 }
 0x2b7   :  { %881 = vsyncpa [#allocation3], 1 }
 0x2b8   :  { %883 = vsyncpa [#allocation3 + $0x1], 1 }
 0x2b9   :  { %884 = vsyncpa [#allocation6], 1 }
 0x2ba   :  { %885 = vsyncpa [#allocation4], 1 }
 0x2bb   :  { %887 = vsyncpa [#allocation4 + $0x1], 1 }

// kernel: tpu_custom_call.1
= control target key start
LH: loop header
LB: loop body
LE: loop exit
PB: predicated region body
PF: predicated region fallthrough
CT: control target
= control target key end

     0   :  { %10 = vsyncpa [#allocation3], 0  ;;  %s1777_s0 = inlined_call_operand.hbm [shape: f32[256,256], index: 0, kind: input, shape index: {}]   ;;  %s1778_s1 = inlined_call_operand.hbm [shape: f32[256,256], index: 1, kind: input, shape index: {}]   ;;  %s1779_s2 = inlined_call_operand.vmem [shape: f32[1,256], index: 2, kind: input, shape index: {}]   ;;  %s1780_s3 = inlined_call_operand.hbm [shape: f32[256,256], index: 3, kind: input, shape index: {}]   ;;  %s1781_s4 = inlined_call_operand.vmem [shape: f32[1,256], index: 4, kind: input, shape index: {}]   ;;  %s1782_s5 = inlined_call_operand.hbm [shape: f32[256,256], index: 5, kind: output, shape index: {}]  }
   0x1   :  { %12 = vsyncpa [#allocation3 + $0x1], 0 }
   0x2   :  { %13 = vsyncpa [#allocation6], 0 }
   0x3   :  { %14 = vsyncpa [#allocation4], 0 }
   0x4   :  { %16 = vsyncpa [#allocation4 + $0x1], 0  ;;  %s1371_s18 = smov 0   ;;  %s1373_s19 = smov 0  }
   0x5   :  { %s1375_s20 = smov 0   ;;  %s1377_s21 = smov 0  }
   0x6 LB: > { %s1392_s22 = sadd.s32 4294967295, %s1331_s21   ;;  %s952_s23 = sadd.s32 4294967294, %s1331_s21   ;;  %s1331_s21 = sphi %s1377_s21, %s1802_s21   ;;  %s1327_s20 = sphi %s1375_s20, %s1801_s20   ;;  %s1323_s19 = sphi %s1373_s19, %s1800_s19   ;;  %s1319_s18 = sphi %s1371_s18, %s1799_s18  }
   0x7   : > { %p42_p0 = scmp.ne.s32.totalorder %s1323_s19, %s1319_s18  ;;  %p1783_p1 = scmp.eq.s32.totalorder %s1392_s22, 0 }
   0x8   : > { %p156_p3 = scmp.eq.s32.totalorder %s952_s23, 1  ;;  %p953_p5 = scmp.ge.s32.totalorder %s1331_s21, 1 }
   0x9   : > { %p1401_p4 = por %p1783_p1, %p42_p0  ;;  %p163_p7 = scmp.lt.s32.totalorder %s1331_s21, 3 }
   0xa   : > { %p1406_p6 = por %p156_p3, %p42_p0  ;;  %s1333_s27 = smov [#allocation5]  }
   0xb   : > { %s1786_s24 = scalar_select %p1401_p4, 1, 0 }
   0xc   : > { %s1787_s25 = scalar_select %p1406_p6, 1, 0 }
   0xd   : > { %p1411_p8 = pnand %p953_p5, %p163_p7  ;;  %s175_s28 = sshll.u32 %s1333_s27, 4  ;;  %s1415_s28 = int_to_ptr.vmem [resolvable:$true] %s175_s28 }
   0xe   : > { %s1334_s30 = smov [#allocation7]   ;;  %s1175_s9 = scalar_lea.hbm %s1778_s1, 8192 }
   0xf   : > { %p1116_p9 = pneg %p1411_p8  ;;  %s191_s6 = sshll.u32 %s1334_s30, 4  ;;  %s1426_s6 = int_to_ptr.vmem [resolvable:$true] %s191_s6 }
  0x10   : > { %p1176_p12 = scmp.ne.s32.totalorder %s1778_s1, %s1175_s9  ;;  %p1182_p5 = scmp.lt.u32.totalorder %s1175_s9, %s1778_s1 }
  0x11   : > { %p1422_p11 = pnand %p1116_p9, %p1783_p1 }
  0x13   : > { %p1177_p13 = pneg %p1422_p11 }
  0x15   : > { %p1178_p0 = pnand %p1177_p13, %p1176_p12 }
  0x17   : > { %p1179_p3 = pneg %p1178_p0 }
  0x19   : > { %p1184_p7 = pnand %p1182_p5, %p1179_p3 }
  0x1b   : > { %1187 = shalt.err (!%p1184_p7)
}
  0x1c   : > { %s1188_s14 = scalar_lea.vmem %s1415_s28, 8192  ;;  %p1196_p2 = scmp.lt.s32.totalorder %s1415_s28, %s1415_s28 }
  0x1d   : > { %p1189_p9 = scmp.ne.s32.totalorder %s1415_s28, %s1188_s14  ;;  %p1197_p12 = scmp.lt.s32.totalorder %s1188_s14, %s1188_s14 }
  0x1f   : > { %p1191_p10 = pnand %p1189_p9, %p1177_p13  ;;  %p1198_p0 = por %p1197_p12, %p1196_p2 }
  0x21   : > { %p1192_p1 = pneg %p1191_p10 }
  0x23   : > { %p1199_p6 = pnand %p1198_p0, %p1192_p1 }
  0x25   : > { %1202 = shalt.err (!%p1199_p6)
}
  0x26   : > { %s1335_s15 = smov 256   ;;  %s1336_s16 = smov 16  }
  0x27   : > { %1119 = dma.hbm_to_vmem [thread:$0]  (!%p1422_p11), %s1778_s1, 8192, %s1415_s28, [#allocation6], %s1335_s15, %s1335_s15, %s1336_s16  }
  0x28   : > { %s1203_s7 = scalar_lea.hbm %s1780_s3, 8192 }
  0x29   : > { %p1204_p1 = scmp.ne.s32.totalorder %s1780_s3, %s1203_s7  ;;  %p1210_p10 = scmp.lt.u32.totalorder %s1203_s7, %s1780_s3 }
  0x2b   : > { %p1206_p2 = pnand %p1204_p1, %p1177_p13 }
  0x2d   : > { %p1207_p6 = pneg %p1206_p2 }
  0x2f   : > { %p1212_p3 = pnand %p1210_p10, %p1207_p6 }
  0x31   : > { %1215 = shalt.err (!%p1212_p3)
}
  0x32   : > { %s1216_s28 = scalar_lea.vmem %s1426_s6, 8192  ;;  %p1224_p12 = scmp.lt.s32.totalorder %s1426_s6, %s1426_s6 }
  0x33   : > { %p1217_p5 = scmp.ne.s32.totalorder %s1426_s6, %s1216_s28  ;;  %p1225_p0 = scmp.lt.s32.totalorder %s1216_s28, %s1216_s28 }
  0x35   : > { %p1219_p7 = pnand %p1217_p5, %p1177_p13  ;;  %p1226_p1 = por %p1225_p0, %p1224_p12 }
  0x37   : > { %p1220_p9 = pneg %p1219_p7 }
  0x39   : > { %p1227_p2 = pnand %p1226_p1, %p1220_p9 }
  0x3b   : > { %1230 = shalt.err (!%p1227_p2)
}
  0x3c   : > { %1122 = dma.hbm_to_vmem [thread:$0]  (!%p1422_p11), %s1780_s3, 8192, %s1426_s6, [#allocation6], %s1335_s15, %s1335_s15, %s1336_s16  }
  0x3d   : > { %s1487_s29 = sadd.s32 1, %s1331_s21   ;;  %s29_s14 = sadd.s32 1, %s1327_s20 }
  0x3e   : > { %s26_s17 = ssub.s32 %s1331_s21, %s1487_s29  ;;  %p36_p13 = scmp.ne.s32.totalorder %s1327_s20, %s1323_s19 }
  0x3f   : > { %p27_p6 = scmp.eq.s32.totalorder %s26_s17, 0  ;;  %p37_p10 = scmp.eq.s32.totalorder %s1331_s21, 0 }
  0x40   : > { %p1790_p3 = scmp.eq.s32.totalorder %s1392_s22, 1  ;;  %p1133_p7 = scmp.lt.s32.totalorder %s1331_s21, 2 }
  0x41   : > { %s1503_s27 = scalar_select %p27_p6, %s1327_s20, %s29_s14  }
  0x42   : > { %p1497_p5 = por %p1790_p3, %p36_p13  ;;  %p38_p9 = por %p37_p10, %p36_p13 }
  0x43   : > { %s208_s30 = sand.u32 1, %s1327_s20   ;;  %s973_s6 = sshll.u32 %s1331_s21, 12 }
  0x44   : > { %s1791_s23 = scalar_select %p1497_p5, 1, 0 }
  0x45   : > { %s957_s7 = sshll.u32 %s208_s30, 8  ;;  %s1510_s10 = scalar_lea.hbm %s1777_s0, %s973_s6 }
  0x46   : > { %s212_s11 = scalar_lea.vmem [#allocation2], %s957_s7  ;;  %p1514_p11 = pnand %p1133_p7, %p38_p9 }
  0x47   : > { %s220_s28 = sshll.u32 %s212_s11, 4  ;;  %s1518_s13 = scalar_lea.sflag [#allocation3], %s208_s30  ;;  %s1512_s28 = int_to_ptr.vmem [resolvable:$true] %s220_s28 }
  0x48   : > { %s1231_s14 = scalar_lea.hbm %s1510_s10, 4096  ;;  %p1233_p0 = pneg %p1514_p11 }
  0x49   : > { %p1232_p12 = scmp.ne.s32.totalorder %s1510_s10, %s1231_s14  ;;  %s1236_s6 = scalar_lea.hbm %s1777_s0, 8192 }
  0x4a   : > { %p1237_p13 = scmp.lt.u32.totalorder %s1510_s10, %s1777_s0  ;;  %p1238_p6 = scmp.lt.u32.totalorder %s1236_s6, %s1231_s14 }
  0x4b   : > { %p1234_p1 = pnand %p1233_p0, %p1232_p12  ;;  %p1240_p3 = scmp.lt.u32.totalorder %s1231_s14, %s1510_s10 }
  0x4c   : > { %p1239_p10 = por %p1238_p6, %p1237_p13 }
  0x4d   : > { %p1235_p2 = pneg %p1234_p1 }
  0x4e   : > { %p1241_p7 = por %p1240_p3, %p1239_p10 }
  0x50   : > { %p1242_p9 = pnand %p1241_p7, %p1235_p2 }
  0x52   : > { %1245 = shalt.err (!%p1242_p9)
}
  0x53   : > { %s1246_s30 = scalar_lea.vmem %s1512_s28, 4096  ;;  %s1337_s11 = smov [#allocation2]  }
  0x54   : > { %p1247_p12 = scmp.ne.s32.totalorder %s1512_s28, %s1246_s30  ;;  %s1251_s17 = sshll.u32 %s1337_s11, 4  ;;  %s1252_s17 = int_to_ptr.vmem [resolvable:$false] %s1251_s17 }
  0x55   : > { %s1253_s7 = scalar_lea.vmem %s1252_s17, 8192  ;;  %p1254_p4 = scmp.lt.s32.totalorder %s1512_s28, %s1252_s17 }
  0x56   : > { %p1249_p1 = pnand %p1247_p12, %p1233_p0  ;;  %p1255_p13 = scmp.lt.s32.totalorder %s1253_s7, %s1246_s30 }
  0x58   : > { %p1250_p5 = pneg %p1249_p1  ;;  %p1256_p6 = por %p1255_p13, %p1254_p4 }
  0x5a   : > { %p1257_p10 = pnand %p1256_p6, %p1250_p5 }
  0x5c   : > { %1260 = shalt.err (!%p1257_p10)
}
  0x5d   : > { %1126 = dma.hbm_to_vmem [thread:$0]  (!%p1514_p11), %s1510_s10, 4096, %s1512_s28, %s1518_s13, %s1335_s15, %s1335_s15, %s1336_s16  }
  0x5e   : > { %232 = sbr.rel (%p1411_p8) target bundleno = 680 (0x2a8), region = 40  ;;  %s1552_s14 = sand.u32 (!%p1411_p8), 1, %s1323_s19  }
  0x5f   : > { %s962_s6 = sshll.u32 (!%p1411_p8), %s1552_s14, 8  ;;  %s235_s8 = scalar_lea.sflag (!%p1411_p8), [#allocation3], %s1552_s14 }
  0x60   : > { %s1558_s12 = scalar_lea.vmem (!%p1411_p8), [#allocation2], %s962_s6  ;;  %p1793_p4 = scmp.ne.s32.totalorder (!%p1411_p8), %s1786_s24, 0 }
  0x65   : > { %1306 = dma.done.wait (%p1793_p4), %s235_s8, 4096  }
  0x66   : > { %1308 = vsyncadd (%p1793_p4), %s235_s8, 4294963200  ;;  %p1794_p5 = scmp.eq.s32.totalorder %s1392_s22, 0 }
  0x68   : > { %1310 = dma.done.wait (%p1794_p5), [#allocation6], 16384   ;;  %p1795_p8 = pmov %p1794_p5 }
  0x69   : > { %v308_v0 = vld [vmem:[#allocation5 + $0x8] sm:$0xff]  ;;  %v310_v1 = vld [vmem:[#allocation5 + $0x18] sm:$0xff]  ;;  %v307_v2 = vld [vmem:[#allocation5] sm:$0xff]  ;;  %s1662_s10 = scalar_lea.vmem [#allocation8], %s962_s6  ;;  %s975_s28 = sshll.u32 %s1392_s22, 12 }
  0x6a   : > { %1312 = vsyncadd (%p1795_p8), [#allocation6], 4294950912  ;;  %v976_v3 = vpack.c.bf16 %v310_v1, %v308_v0  ;;  %v309_v4 = vld [vmem:[#allocation5 + $0x10] sm:$0xff]  ;;  %v312_v5 = vld [vmem:[#allocation5 + $0x28] sm:$0xff]  ;;  %s860_s13 = sshll.u32 %s1662_s10, 4  ;;  %s1728_s11 = scalar_lea.hbm %s1782_s5, %s975_s28  ;;  %s1730_s13 = int_to_ptr.vmem [resolvable:$true] %s860_s13 }
  0x6b   : > { %v314_v6 = vld [vmem:[#allocation5 + $0x38] sm:$0xff]  ;;  %v978_v7 = vpack.c.bf16 %v309_v4, %v307_v2  ;;  %v311_v9 = vld [vmem:[#allocation5 + $0x20] sm:$0xff]  ;;  %v313_v10 = vld [vmem:[#allocation5 + $0x30] sm:$0xff]  ;;  %s846_s22 = scalar_lea.sflag [#allocation4], %s1552_s14  ;;  %s1261_s17 = scalar_lea.vmem %s1730_s13, 4096 }
  0x6c   : > { %v980_v8 = vpack.c.bf16 %v314_v6, %v312_v5  ;;  %v316_v11 = vld [vmem:[#allocation5 + $0x48] sm:$0xff]  ;;  %977 = vmatprep.subr.bf16.mxu0 %v976_v3  ;;  %v318_v12 = vld [vmem:[#allocation5 + $0x58] sm:$0xff]  ;;  %v982_v13 = vpack.c.bf16 %v313_v10, %v311_v9  ;;  %v315_v15 = vld [vmem:[#allocation5 + $0x40] sm:$0xff]  ;;  %p1262_p11 = scmp.ne.s32.totalorder %s1730_s13, %s1261_s17  ;;  %p1796_p0 = scmp.ne.s32.totalorder %s1791_s23, 0 }
  0x6d   : > { %979 = vmatpush1.bf16.msra.mxu0 %v978_v7  ;;  %v984_v14 = vpack.c.bf16 %v318_v12, %v316_v11  ;;  %v317_v16 = vld [vmem:[#allocation5 + $0x50] sm:$0xff]  ;;  %v320_v17 = vld [vmem:[#allocation5 + $0x68] sm:$0xff]  ;;  %v322_v18 = vld [vmem:[#allocation5 + $0x78] sm:$0xff]  ;;  %s1338_s7 = smov [#allocation8]  }
  0x6e   : > { %981 = vmatprep.subr.bf16.mxu0 %v980_v8  ;;  %v986_v19 = vpack.c.bf16 %v317_v16, %v315_v15  ;;  %v988_v20 = vpack.c.bf16 %v322_v18, %v320_v17  ;;  %v319_v21 = vld [vmem:[#allocation5 + $0x60] sm:$0xff]  ;;  %v321_v22 = vld [vmem:[#allocation5 + $0x70] sm:$0xff]  ;;  %v324_v23 = vld [vmem:[#allocation5 + $0x88] sm:$0xff]  ;;  %p1263_p2 = pnand %p1262_p11, %p1796_p0  ;;  %s1265_s6 = sshll.u32 %s1338_s7, 4  ;;  %s1266_s6 = int_to_ptr.vmem [resolvable:$false] %s1265_s6 }
  0x6f   : > { %v326_v24 = vld [vmem:[#allocation5 + $0x98] sm:$0xff]  ;;  %v990_v25 = vpack.c.bf16 %v321_v22, %v319_v21  ;;  %v323_v27 = vld [vmem:[#allocation5 + $0x80] sm:$0xff]  ;;  %v325_v28 = vld [vmem:[#allocation5 + $0x90] sm:$0xff]  ;;  %s1267_s8 = scalar_lea.vmem %s1266_s6, 8192  ;;  %p1268_p7 = scmp.lt.s32.totalorder %s1730_s13, %s1266_s6 }
  0x70   : > { %v992_v26 = vpack.c.bf16 %v326_v24, %v324_v23  ;;  %v328_v29 = vld [vmem:[#allocation5 + $0xa8] sm:$0xff]  ;;  %v330_v30 = vld [vmem:[#allocation5 + $0xb8] sm:$0xff]  ;;  %v994_v31 = vpack.c.bf16 %v325_v28, %v323_v27  ;;  %v327_v33 = vld [vmem:[#allocation5 + $0xa0] sm:$0xff]  ;;  %p1264_p3 = pneg %p1263_p2  ;;  %p1269_p9 = scmp.lt.s32.totalorder %s1267_s8, %s1261_s17 }
  0x71   : > { %983 = vmatpush1.bf16.msra.mxu0 %v982_v13  ;;  %v996_v32 = vpack.c.bf16 %v330_v30, %v328_v29  ;;  %v329_v34 = vld [vmem:[#allocation5 + $0xb0] sm:$0xff]  ;;  %v332_v35 = vld [vmem:[#allocation5 + $0xc8] sm:$0xff]  ;;  %v334_v36 = vld [vmem:[#allocation5 + $0xd8] sm:$0xff] }
  0x72   : > { %985 = vmatprep.subr.bf16.mxu0 %v984_v14  ;;  %v998_v37 = vpack.c.bf16 %v329_v34, %v327_v33  ;;  %v1000_v38 = vpack.c.bf16 %v334_v36, %v332_v35  ;;  %v331_v39 = vld [vmem:[#allocation5 + $0xc0] sm:$0xff]  ;;  %v333_v40 = vld [vmem:[#allocation5 + $0xd0] sm:$0xff]  ;;  %v276_v41 = vld [vmem:[%s1558_s12 + $0x8] sm:$0xff]  ;;  %p1270_p12 = por %p1269_p9, %p1268_p7 }
  0x73   : > { %v336_v42 = vld [vmem:[#allocation5 + $0xe8] sm:$0xff]  ;;  %v338_v43 = vld [vmem:[#allocation5 + $0xf8] sm:$0xff]  ;;  %447 = vmatprep.mubr.f32.mxu0 %v276_v41  ;;  %v1002_v44 = vpack.c.bf16 %v333_v40, %v331_v39  ;;  %v335_v46 = vld [vmem:[#allocation5 + $0xe0] sm:$0xff] }
  0x74   : > { %v1004_v45 = vpack.c.bf16 %v338_v43, %v336_v42  ;;  %v337_v47 = vld [vmem:[#allocation5 + $0xf0] sm:$0xff]  ;;  %v340_v48 = vld [vmem:[#allocation5 + $0x108] sm:$0xff]  ;;  %v342_v49 = vld [vmem:[#allocation5 + $0x118] sm:$0xff]  ;;  %p1271_p1 = pnand %p1270_p12, %p1264_p3 }
  0x75   : > { %987 = vmatpush1.bf16.msra.mxu0 %v986_v19  ;;  %v1006_v50 = vpack.c.bf16 %v337_v47, %v335_v46  ;;  %v1008_v51 = vpack.c.bf16 %v342_v49, %v340_v48  ;;  %v339_v52 = vld [vmem:[#allocation5 + $0x100] sm:$0xff]  ;;  %v341_v53 = vld [vmem:[#allocation5 + $0x110] sm:$0xff]  ;;  %v344_v54 = vld [vmem:[#allocation5 + $0x128] sm:$0xff] }
  0x76   : > { %989 = vmatprep.subr.bf16.mxu0 %v988_v20  ;;  %v346_v55 = vld [vmem:[#allocation5 + $0x138] sm:$0xff]  ;;  %v343_v56 = vld [vmem:[#allocation5 + $0x120] sm:$0xff]  ;;  %v345_v57 = vld [vmem:[#allocation5 + $0x130] sm:$0xff]  ;;  %v1010_v58 = vpack.c.bf16 %v341_v53, %v339_v52 }
  0x77   : > { %v348_v59 = vld [vmem:[#allocation5 + $0x148] sm:$0xff]  ;;  %v350_v60 = vld [vmem:[#allocation5 + $0x158] sm:$0xff]  ;;  %v576_v63 = vld [vmem:[#allocation7] sm:$0xff]  ;;  %v1012_v0 = vpack.c.bf16 %v346_v55, %v344_v54  ;;  %v1014_v11 = vpack.c.bf16 %v345_v57, %v343_v56 }
  0x78   : > { %v577_v61 = vld [vmem:[#allocation7 + $0x8] sm:$0xff]  ;;  %v579_v62 = vld [vmem:[#allocation7 + $0x18] sm:$0xff]  ;;  %v578_v2 = vld [vmem:[#allocation7 + $0x10] sm:$0xff]  ;;  %v1016_v15 = vpack.c.bf16 %v350_v60, %v348_v59 }
  0x79   : > { %991 = vmatpush1.bf16.msra.mxu0 %v990_v25  ;;  %v1040_v1 = vpack.c.bf16 %v579_v62, %v577_v61  ;;  %v581_v3 = vld [vmem:[#allocation7 + $0x28] sm:$0xff]  ;;  %v583_v4 = vld [vmem:[#allocation7 + $0x38] sm:$0xff]  ;;  %v1042_v5 = vpack.c.bf16 %v578_v2, %v576_v63  ;;  %v580_v7 = vld [vmem:[#allocation7 + $0x20] sm:$0xff] }
  0x7a   : > { %993 = vmatprep.subr.bf16.mxu0 %v992_v26  ;;  %v1044_v6 = vpack.c.bf16 %v583_v4, %v581_v3  ;;  %v582_v8 = vld [vmem:[#allocation7 + $0x30] sm:$0xff]  ;;  %v585_v9 = vld [vmem:[#allocation7 + $0x48] sm:$0xff]  ;;  %v587_v10 = vld [vmem:[#allocation7 + $0x58] sm:$0xff] }
  0x7b   : > { %1041 = vmatprep.subr.bf16.mxu1 %v1040_v1  ;;  %v347_v12 = vld [vmem:[#allocation5 + $0x140] sm:$0xff]  ;;  %v349_v13 = vld [vmem:[#allocation5 + $0x150] sm:$0xff]  ;;  %v1046_v14 = vpack.c.bf16 %v582_v8, %v580_v7  ;;  %v352_v16 = vld [vmem:[#allocation5 + $0x168] sm:$0xff]  ;;  %v1048_v17 = vpack.c.bf16 %v587_v10, %v585_v9 }
  0x7c   : > { %1043 = vmatpush1.bf16.msra.mxu1 %v1042_v5  ;;  %v584_v18 = vld [vmem:[#allocation7 + $0x40] sm:$0xff]  ;;  %v586_v19 = vld [vmem:[#allocation7 + $0x50] sm:$0xff]  ;;  %v354_v20 = vld [vmem:[#allocation5 + $0x178] sm:$0xff]  ;;  %v1018_v23 = vpack.c.bf16 %v349_v13, %v347_v12 }
  0x7d   : > { %995 = vmatpush1.bf16.msra.mxu0 %v994_v31  ;;  %1045 = vmatprep.subr.bf16.mxu1 %v1044_v6  ;;  %v589_v21 = vld [vmem:[#allocation7 + $0x68] sm:$0xff]  ;;  %v591_v22 = vld [vmem:[#allocation7 + $0x78] sm:$0xff]  ;;  %v351_v24 = vld [vmem:[#allocation5 + $0x160] sm:$0xff]  ;;  %v1050_v26 = vpack.c.bf16 %v586_v19, %v584_v18  ;;  %v1020_v27 = vpack.c.bf16 %v354_v20, %v352_v16 }
  0x7e   : > { %997 = vmatprep.subr.bf16.mxu0 %v996_v32  ;;  %v353_v25 = vld [vmem:[#allocation5 + $0x170] sm:$0xff]  ;;  %v356_v28 = vld [vmem:[#allocation5 + $0x188] sm:$0xff]  ;;  %v1052_v29 = vpack.c.bf16 %v591_v22, %v589_v21  ;;  %v588_v30 = vld [vmem:[#allocation7 + $0x60] sm:$0xff] }
  0x7f   : > { %v590_v31 = vld [vmem:[#allocation7 + $0x70] sm:$0xff]  ;;  %v358_v32 = vld [vmem:[#allocation5 + $0x198] sm:$0xff]  ;;  %v593_v33 = vld [vmem:[#allocation7 + $0x88] sm:$0xff]  ;;  %v1022_v35 = vpack.c.bf16 %v353_v25, %v351_v24 }
  0x80   : > { %1047 = vmatpush1.bf16.msra.mxu1 %v1046_v14  ;;  %v595_v34 = vld [vmem:[#allocation7 + $0x98] sm:$0xff]  ;;  %v355_v36 = vld [vmem:[#allocation5 + $0x180] sm:$0xff]  ;;  %v1024_v39 = vpack.c.bf16 %v358_v32, %v356_v28  ;;  %v360_v40 = vld [vmem:[#allocation5 + $0x1a8] sm:$0xff] }
  0x81   : > { %999 = vmatpush1.bf16.msra.mxu0 %v998_v37  ;;  %1049 = vmatprep.subr.bf16.mxu1 %v1048_v17  ;;  %v357_v37 = vld [vmem:[#allocation5 + $0x190] sm:$0xff]  ;;  %v1056_v41 = vpack.c.bf16 %v595_v34, %v593_v33  ;;  %v592_v42 = vld [vmem:[#allocation7 + $0x80] sm:$0xff]  ;;  %v599_v46 = vld [vmem:[#allocation7 + $0xb8] sm:$0xff] }
  0x82   : > { %1001 = vmatprep.subr.bf16.mxu0 %v1000_v38  ;;  %v1054_v38 = vpack.c.bf16 %v590_v31, %v588_v30  ;;  %v594_v43 = vld [vmem:[#allocation7 + $0x90] sm:$0xff]  ;;  %v1026_v47 = vpack.c.bf16 %v357_v37, %v355_v36  ;;  %v359_v48 = vld [vmem:[#allocation5 + $0x1a0] sm:$0xff]  ;;  %v364_v52 = vld [vmem:[#allocation5 + $0x1c8] sm:$0xff] }
  0x83   : > { %v361_v49 = vld [vmem:[#allocation5 + $0x1b0] sm:$0xff]  ;;  %v596_v54 = vld [vmem:[#allocation7 + $0xa0] sm:$0xff]  ;;  %v366_v56 = vld [vmem:[#allocation5 + $0x1d8] sm:$0xff] }
  0x84   : > { %1051 = vmatpush1.bf16.msra.mxu1 %v1050_v26  ;;  %v598_v55 = vld [vmem:[#allocation7 + $0xb0] sm:$0xff]  ;;  %v601_v57 = vld [vmem:[#allocation7 + $0xc8] sm:$0xff]  ;;  %v1030_v59 = vpack.c.bf16 %v361_v49, %v359_v48  ;;  %v363_v60 = vld [vmem:[#allocation5 + $0x1c0] sm:$0xff]  ;;  %v1032_v63 = vpack.c.bf16 %v366_v56, %v364_v52 }
  0x85   : > { %1003 = vmatpush1.bf16.msra.mxu0 %v1002_v44  ;;  %1053 = vmatprep.subr.bf16.mxu1 %v1052_v29  ;;  %v362_v44 = vld [vmem:[#allocation5 + $0x1b8] sm:$0xff]  ;;  %v365_v61 = vld [vmem:[#allocation5 + $0x1d0] sm:$0xff]  ;;  %v1062_v62 = vpack.c.bf16 %v598_v55, %v596_v54  ;;  %v600_v2 = vld [vmem:[#allocation7 + $0xc0] sm:$0xff] }
  0x86   : > { %1005 = vmatprep.subr.bf16.mxu0 %v1004_v45  ;;  %v597_v45 = vld [vmem:[#allocation7 + $0xa8] sm:$0xff]  ;;  %v602_v3 = vld [vmem:[#allocation7 + $0xd0] sm:$0xff]  ;;  %v370_v4 = vld [vmem:[#allocation5 + $0x1f8] sm:$0xff]  ;;  %v1034_v7 = vpack.c.bf16 %v365_v61, %v363_v60 }
  0x87   : > { %v1060_v53 = vpack.c.bf16 %v599_v46, %v597_v45  ;;  %v605_v5 = vld [vmem:[#allocation7 + $0xe8] sm:$0xff]  ;;  %v607_v6 = vld [vmem:[#allocation7 + $0xf8] sm:$0xff]  ;;  %v367_v8 = vld [vmem:[#allocation5 + $0x1e0] sm:$0xff]  ;;  %v1066_v9 = vpack.c.bf16 %v602_v3, %v600_v2 }
  0x88   : > { %1055 = vmatpush1.bf16.msra.mxu1 %v1054_v38  ;;  %v1068_v12 = vpack.c.bf16 %v607_v6, %v605_v5  ;;  %v604_v13 = vld [vmem:[#allocation7 + $0xe0] sm:$0xff]  ;;  %v606_v14 = vld [vmem:[#allocation7 + $0xf0] sm:$0xff]  ;;  %v611_v16 = vld [vmem:[#allocation7 + $0x118] sm:$0xff] }
  0x89   : > { %1007 = vmatpush1.bf16.msra.mxu0 %v1006_v50  ;;  %v1058_v50 = vpack.c.bf16 %v594_v43, %v592_v42  ;;  %1057 = vmatprep.subr.bf16.mxu1 %v1056_v41  ;;  %v1070_v18 = vpack.c.bf16 %v606_v14, %v604_v13  ;;  %v608_v20 = vld [vmem:[#allocation7 + $0x100] sm:$0xff]  ;;  %v610_v21 = vld [vmem:[#allocation7 + $0x110] sm:$0xff]  ;;  %v613_v22 = vld [vmem:[#allocation7 + $0x128] sm:$0xff] }
  0x8a   : > { %1009 = vmatprep.subr.bf16.mxu0 %v1008_v51  ;;  %v1028_v51 = vpack.c.bf16 %v362_v44, %v360_v40  ;;  %v275_v24 = vld [vmem:[%s1558_s12] sm:$0xff]  ;;  %v1074_v25 = vpack.c.bf16 %v610_v21, %v608_v20  ;;  %v278_v26 = vld [vmem:[%s1558_s12 + $0x18] sm:$0xff]  ;;  %v614_v29 = vld [vmem:[#allocation7 + $0x130] sm:$0xff] }
  0x8b   : > { %v612_v28 = vld [vmem:[#allocation7 + $0x120] sm:$0xff]  ;;  %v617_v30 = vld [vmem:[#allocation7 + $0x148] sm:$0xff]  ;;  %v619_v31 = vld [vmem:[#allocation7 + $0x158] sm:$0xff] }
  0x8c   : > { %1059 = vmatpush1.bf16.msra.mxu1 %v1058_v50  ;;  %v277_v32 = vld [vmem:[%s1558_s12 + $0x10] sm:$0xff]  ;;  %v1078_v33 = vpack.c.bf16 %v614_v29, %v612_v28  ;;  %v280_v34 = vld [vmem:[%s1558_s12 + $0x28] sm:$0xff]  ;;  %v616_v36 = vld [vmem:[#allocation7 + $0x140] sm:$0xff] }
  0x8d   : > { %1011 = vmatpush1.bf16.msra.mxu0 %v1010_v58  ;;  %v603_v58 = vld [vmem:[#allocation7 + $0xd8] sm:$0xff]  ;;  %1061 = vmatprep.subr.bf16.mxu1 %v1060_v53  ;;  %v618_v37 = vld [vmem:[#allocation7 + $0x150] sm:$0xff]  ;;  %v621_v38 = vld [vmem:[#allocation7 + $0x168] sm:$0xff] }
  0x8e   : > { %1013 = vmatprep.subr.bf16.mxu0 %v1012_v0  ;;  %v368_v0 = vld [vmem:[#allocation5 + $0x1e8] sm:$0xff]  ;;  %v1064_v1 = vpack.c.bf16 %v603_v58, %v601_v57  ;;  %v279_v40 = vld [vmem:[%s1558_s12 + $0x20] sm:$0xff]  ;;  %v1082_v41 = vpack.c.bf16 %v618_v37, %v616_v36  ;;  %v282_v42 = vld [vmem:[%s1558_s12 + $0x38] sm:$0xff] }
  0x8f   : > { %v1036_v10 = vpack.c.bf16 %v370_v4, %v368_v0  ;;  %v620_v44 = vld [vmem:[#allocation7 + $0x160] sm:$0xff]  ;;  %v622_v45 = vld [vmem:[#allocation7 + $0x170] sm:$0xff]  ;;  %v625_v46 = vld [vmem:[#allocation7 + $0x188] sm:$0xff] }
  0x90   : > { %1063 = vmatpush1.bf16.msra.mxu1 %v1062_v62  ;;  %v281_v48 = vld [vmem:[%s1558_s12 + $0x30] sm:$0xff]  ;;  %v1086_v49 = vpack.c.bf16 %v622_v45, %v620_v44  ;;  %v284_v50 = vld [vmem:[%s1558_s12 + $0x48] sm:$0xff]  ;;  %v624_v52 = vld [vmem:[#allocation7 + $0x180] sm:$0xff] }
  0x91   : > { %1015 = vmatpush1.bf16.msra.mxu0 %v1014_v11  ;;  %v369_v11 = vld [vmem:[#allocation5 + $0x1f0] sm:$0xff]  ;;  %1065 = vmatprep.subr.bf16.mxu1 %v1064_v1  ;;  %v629_v54 = vld [vmem:[#allocation7 + $0x1a8] sm:$0xff]  ;;  %v631_v55 = vld [vmem:[#allocation7 + $0x1b8] sm:$0xff] }
  0x92   : > { %1017 = vmatprep.subr.bf16.mxu0 %v1016_v15  ;;  %v609_v15 = vld [vmem:[#allocation7 + $0x108] sm:$0xff]  ;;  %v1038_v17 = vpack.c.bf16 %v369_v11, %v367_v8  ;;  %v626_v53 = vld [vmem:[#allocation7 + $0x190] sm:$0xff]  ;;  %v283_v56 = vld [vmem:[%s1558_s12 + $0x40] sm:$0xff] }
  0x93   : > { %v1072_v19 = vpack.c.bf16 %v611_v16, %v609_v15  ;;  %v1090_v57 = vpack.c.bf16 %v626_v53, %v624_v52  ;;  %v286_v58 = vld [vmem:[%s1558_s12 + $0x58] sm:$0xff]  ;;  %v628_v60 = vld [vmem:[#allocation7 + $0x1a0] sm:$0xff]  ;;  %v630_v61 = vld [vmem:[#allocation7 + $0x1b0] sm:$0xff] }
  0x94   : > { %1067 = vmatpush1.bf16.msra.mxu1 %v1066_v9  ;;  %v633_v62 = vld [vmem:[#allocation7 + $0x1c8] sm:$0xff]  ;;  %v285_v0 = vld [vmem:[%s1558_s12 + $0x50] sm:$0xff]  ;;  %v1094_v1 = vpack.c.bf16 %v630_v61, %v628_v60  ;;  %v287_v4 = vld [vmem:[%s1558_s12 + $0x60] sm:$0xff] }
  0x95   : > { %1019 = vmatpush1.bf16.msra.mxu0 %v1018_v23  ;;  %1069 = vmatprep.subr.bf16.mxu1 %v1068_v12  ;;  %v615_v23 = vld [vmem:[#allocation7 + $0x138] sm:$0xff]  ;;  %v288_v2 = vld [vmem:[%s1558_s12 + $0x68] sm:$0xff]  ;;  %v289_v6 = vld [vmem:[%s1558_s12 + $0x70] sm:$0xff] }
  0x96   : > { %1021 = vmatprep.subr.bf16.mxu0 %v1020_v27  ;;  %v1076_v27 = vpack.c.bf16 %v615_v23, %v613_v22  ;;  %v290_v5 = vld [vmem:[%s1558_s12 + $0x78] sm:$0xff]  ;;  %v291_v8 = vld [vmem:[%s1558_s12 + $0x80] sm:$0xff]  ;;  %v296_v11 = vld [vmem:[%s1558_s12 + $0xa8] sm:$0xff] }
  0x97   : > { %v294_v9 = vld [vmem:[%s1558_s12 + $0x98] sm:$0xff]  ;;  %v295_v12 = vld [vmem:[%s1558_s12 + $0xa0] sm:$0xff]  ;;  %v297_v14 = vld [vmem:[%s1558_s12 + $0xb0] sm:$0xff] }
  0x98   : > { %1071 = vmatpush1.bf16.msra.mxu1 %v1070_v18  ;;  %v298_v13 = vld [vmem:[%s1558_s12 + $0xb8] sm:$0xff]  ;;  %v300_v15 = vld [vmem:[%s1558_s12 + $0xc8] sm:$0xff]  ;;  %v299_v16 = vld [vmem:[%s1558_s12 + $0xc0] sm:$0xff] }
  0x99   : > { %1023 = vmatpush1.bf16.msra.mxu0 %v1022_v35  ;;  %1073 = vmatprep.subr.bf16.mxu1 %v1072_v19  ;;  %v1080_v35 = vpack.c.bf16 %v619_v31, %v617_v30  ;;  %v301_v18 = vld [vmem:[%s1558_s12 + $0xd0] sm:$0xff]  ;;  %v304_v19 = vld [vmem:[%s1558_s12 + $0xe8] sm:$0xff]  ;;  %v303_v20 = vld [vmem:[%s1558_s12 + $0xe0] sm:$0xff] }
  0x9a   : > { %1025 = vmatprep.subr.bf16.mxu0 %v1024_v39  ;;  %v623_v39 = vld [vmem:[#allocation7 + $0x178] sm:$0xff]  ;;  %v305_v22 = vld [vmem:[%s1558_s12 + $0xf0] sm:$0xff]  ;;  %v632_v23 = vld [vmem:[#allocation7 + $0x1c0] sm:$0xff] }
  0x9b   : > { %v1084_v43 = vpack.c.bf16 %v623_v39, %v621_v38  ;;  %v306_v21 = vld [vmem:[%s1558_s12 + $0xf8] sm:$0xff]  ;;  %v636_v29 = vld [vmem:[#allocation7 + $0x1e0] sm:$0xff]  ;;  %v638_v30 = vld [vmem:[#allocation7 + $0x1f0] sm:$0xff] }
  0x9c   : > { %1075 = vmatpush1.bf16.msra.mxu1 %v1074_v25  ;;  %v1102_v31 = vpack.c.bf16 %v638_v30, %v636_v29 }
  0x9d   : > { %1027 = vmatpush1.bf16.msra.mxu0 %v1026_v47  ;;  %1077 = vmatprep.subr.bf16.mxu1 %v1076_v27  ;;  %v627_v47 = vld [vmem:[#allocation7 + $0x198] sm:$0xff] }
  0x9e   : > { %1029 = vmatprep.subr.bf16.mxu0 %v1028_v51  ;;  %v1088_v51 = vpack.c.bf16 %v627_v47, %v625_v46  ;;  %v639_v27 = vld [vmem:[#allocation7 + $0x1f8] sm:$0xff] }
  0xa0   : > { %1079 = vmatpush1.bf16.msra.mxu1 %v1078_v33 }
  0xa1   : > { %1031 = vmatpush1.bf16.msra.mxu0 %v1030_v59  ;;  %1081 = vmatprep.subr.bf16.mxu1 %v1080_v35  ;;  %v1092_v59 = vpack.c.bf16 %v631_v55, %v629_v54  ;;  %v371_v35 = vld [vmem:[%s1779_s2] sm:$0x3] }
  0xa2   : > { %1033 = vmatprep.subr.bf16.mxu0 %v1032_v63  ;;  %v635_v63 = vld [vmem:[#allocation7 + $0x1d8] sm:$0xff] }
  0xa3   : > { %v1096_v3 = vpack.c.bf16 %v635_v63, %v633_v62 }
  0xa4   : > { %1083 = vmatpush1.bf16.msra.mxu1 %v1082_v41 }
  0xa5   : > { %1035 = vmatpush1.bf16.msra.mxu0 %v1034_v7  ;;  %1085 = vmatprep.subr.bf16.mxu1 %v1084_v43  ;;  %v292_v7 = vld [vmem:[%s1558_s12 + $0x88] sm:$0xff] }
  0xa6   : > { %1037 = vmatprep.subr.bf16.mxu0 %v1036_v10  ;;  %v293_v10 = vld [vmem:[%s1558_s12 + $0x90] sm:$0xff] }
  0xa8   : > { %1087 = vmatpush1.bf16.msra.mxu1 %v1086_v49 }
  0xa9   : > { %1039 = vmatpush1.bf16.msra.mxu0 %v1038_v17  ;;  %1089 = vmatprep.subr.bf16.mxu1 %v1088_v51  ;;  %v302_v17 = vld [vmem:[%s1558_s12 + $0xd8] sm:$0xff] }
  0xac   : > { %448 = vmatmul.mubr.f32.vlgmr.msra.gmra.mrb[0].mxu0 %v275_v24  ;;  %1091 = vmatpush1.bf16.msra.mxu1 %v1090_v57  ;;  %v634_v24 = vld [vmem:[#allocation7 + $0x1d0] sm:$0xff] }
  0xad   : > { %453 = vmatprep.mubr.f32.mxu0 %v278_v26  ;;  %1093 = vmatprep.subr.bf16.mxu1 %v1092_v59  ;;  %v1098_v25 = vpack.c.bf16 %v634_v24, %v632_v23  ;;  %v637_v26 = vld [vmem:[#allocation7 + $0x1e8] sm:$0xff] }
  0xae   : > { %v1100_v28 = vpack.c.bf16 %v639_v27, %v637_v26 }
  0xb0   : > { %454 = vmatmul.mubr.f32.gmra.mrb[2].mxu0 %v277_v32  ;;  %1095 = vmatpush1.bf16.msra.mxu1 %v1094_v1  ;;  %v373_v32 = vlaneseq }
  0xb1   : > { %459 = vmatprep.mubr.f32.mxu0 %v280_v34  ;;  %1097 = vmatprep.subr.bf16.mxu1 %v1096_v3 }
  0xb2   : > { %v1600_v33 = vshrl.u32 %v373_v32, 7 }
  0xb4   : > { %460 = vmatmul.mubr.f32.gmra.mrb[4].mxu0 %v279_v40  ;;  %1099 = vmatpush1.bf16.msra.mxu1 %v1098_v25  ;;  %v375_v34 = vsub.s32 0, %v1600_v33  ;;  %v379_v36 = vsub.s32 1, %v1600_v33 }
  0xb5   : > { %465 = vmatprep.mubr.f32.mxu0 %v282_v42  ;;  %1101 = vmatprep.subr.bf16.mxu1 %v1100_v28 }
  0xb6   : > { %v1609_v37 = vrot.slane %v371_v35, %v375_v34  ;;  %v1613_v38 = vrot.slane %v371_v35, %v379_v36 }
  0xb8   : > { %466 = vmatmul.mubr.f32.gmra.mrb[6].mxu0 %v281_v48  ;;  %1103 = vmatpush1.bf16.msra.mxu1 %v1102_v31 }
  0xb9   : > { %471 = vmatprep.mubr.f32.mxu0 %v284_v50 }
  0xbc   : > { %472 = vmatmul.mubr.f32.gmra.mrb[8].mxu0 %v283_v56 }
  0xbd   : > { %477 = vmatprep.mubr.f32.mxu0 %v286_v58 }
  0xc0   : > { %478 = vmatmul.mubr.f32.gmra.mrb[10].mxu0 %v285_v0 }
  0xc1   : > { %483 = vmatprep.mubr.f32.mxu0 %v288_v2 }
  0xc4   : > { %484 = vmatmul.mubr.f32.gmra.mrb[12].mxu0 %v287_v4 }
  0xc5   : > { %489 = vmatprep.mubr.f32.mxu0 %v290_v5 }
  0xc8   : > { %490 = vmatmul.mubr.f32.gmra.mrb[14].mxu0 %v289_v6 }
  0xc9   : > { %495 = vmatprep.mubr.f32.mxu0 %v292_v7 }
  0xcc   : > { %496 = vmatmul.mubr.f32.gmra.mrb[16].mxu0 %v291_v8 }
  0xcd   : > { %501 = vmatprep.mubr.f32.mxu0 %v294_v9 }
  0xd0   : > { %502 = vmatmul.mubr.f32.gmra.mrb[18].mxu0 %v293_v10 }
  0xd1   : > { %507 = vmatprep.mubr.f32.mxu0 %v296_v11 }
  0xd4   : > { %508 = vmatmul.mubr.f32.gmra.mrb[20].mxu0 %v295_v12 }
  0xd5   : > { %513 = vmatprep.mubr.f32.mxu0 %v298_v13 }
  0xd8   : > { %514 = vmatmul.mubr.f32.gmra.mrb[22].mxu0 %v297_v14 }
  0xd9   : > { %519 = vmatprep.mubr.f32.mxu0 %v300_v15 }
  0xdc   : > { %520 = vmatmul.mubr.f32.gmra.mrb[24].mxu0 %v299_v16 }
  0xdd   : > { %525 = vmatprep.mubr.f32.mxu0 %v302_v17 }
  0xe0   : > { %526 = vmatmul.mubr.f32.gmra.mrb[26].mxu0 %v301_v18 }
  0xe1   : > { %531 = vmatprep.mubr.f32.mxu0 %v304_v19 }
  0xe4   : > { %532 = vmatmul.mubr.f32.gmra.mrb[28].mxu0 %v303_v20 }
  0xe5   : > { %537 = vmatprep.mubr.f32.mxu0 %v306_v21 }
  0xe8   : > { %538 = vmatmul.mubr.f32.gmra.mrb[30].mxu0 %v305_v22 }
 0x17f   : > { %v449_v39 = vpop.f32.mrb[0].mxu0 }
 0x180   : > { %v450_v40 = vadd.f32 %v449_v39, %v1609_v37  ;;  %v451_v41 = vpop.f32.mrb[1].mxu0 }
 0x181   : > { %v452_v42 = vadd.f32 %v451_v41, %v1613_v38 }
 0x182   : > { %v544_v45 = vmax.f32 %v450_v40, 0.0 }
 0x183   : > { %v455_v43 = vpop.f32.mrb[2].mxu0  ;;  %v545_v44 = vmax.f32 %v452_v42, 0.0 }
 0x184   : > { %v456_v46 = vadd.f32 %v455_v43, %v1609_v37  ;;  %v457_v47 = vpop.f32.mrb[3].mxu0 }
 0x185   : > { %v458_v48 = vadd.f32 %v457_v47, %v1613_v38  ;;  %716 = vmatprep.mubr.f32.mxu1 %v545_v44 }
 0x186   : > { %717 = vmatmul.mubr.f32.vlgmr.msra.gmra.mrb[0].mxu1 %v544_v45  ;;  %v546_v51 = vmax.f32 %v456_v46, 0.0 }
 0x187   : > { %v547_v49 = vmax.f32 %v458_v48, 0.0  ;;  %v461_v50 = vpop.f32.mrb[4].mxu0 }
 0x188   : > { %v462_v52 = vadd.f32 %v461_v50, %v1609_v37  ;;  %v463_v53 = vpop.f32.mrb[5].mxu0 }
 0x189   : > { %v464_v54 = vadd.f32 %v463_v53, %v1613_v38  ;;  %722 = vmatprep.mubr.f32.mxu1 %v547_v49 }
 0x18a   : > { %723 = vmatmul.mubr.f32.gmra.mrb[2].mxu1 %v546_v51  ;;  %v548_v57 = vmax.f32 %v462_v52, 0.0 }
 0x18b   : > { %v549_v55 = vmax.f32 %v464_v54, 0.0  ;;  %v467_v56 = vpop.f32.mrb[6].mxu0 }
 0x18c   : > { %v468_v58 = vadd.f32 %v467_v56, %v1609_v37  ;;  %v469_v59 = vpop.f32.mrb[7].mxu0 }
 0x18d   : > { %v470_v60 = vadd.f32 %v469_v59, %v1613_v38  ;;  %728 = vmatprep.mubr.f32.mxu1 %v549_v55 }
 0x18e   : > { %729 = vmatmul.mubr.f32.gmra.mrb[4].mxu1 %v548_v57  ;;  %v550_v63 = vmax.f32 %v468_v58, 0.0 }
 0x18f   : > { %v551_v61 = vmax.f32 %v470_v60, 0.0  ;;  %v473_v62 = vpop.f32.mrb[8].mxu0 }
 0x190   : > { %v474_v0 = vadd.f32 %v473_v62, %v1609_v37  ;;  %v475_v1 = vpop.f32.mrb[9].mxu0 }
 0x191   : > { %v476_v2 = vadd.f32 %v475_v1, %v1613_v38  ;;  %734 = vmatprep.mubr.f32.mxu1 %v551_v61 }
 0x192   : > { %735 = vmatmul.mubr.f32.gmra.mrb[6].mxu1 %v550_v63  ;;  %v552_v5 = vmax.f32 %v474_v0, 0.0 }
 0x193   : > { %v553_v3 = vmax.f32 %v476_v2, 0.0  ;;  %v479_v4 = vpop.f32.mrb[10].mxu0 }
 0x194   : > { %v480_v6 = vadd.f32 %v479_v4, %v1609_v37  ;;  %v481_v7 = vpop.f32.mrb[11].mxu0 }
 0x195   : > { %v482_v8 = vadd.f32 %v481_v7, %v1613_v38  ;;  %740 = vmatprep.mubr.f32.mxu1 %v553_v3 }
 0x196   : > { %741 = vmatmul.mubr.f32.gmra.mrb[8].mxu1 %v552_v5  ;;  %v554_v11 = vmax.f32 %v480_v6, 0.0 }
 0x197   : > { %v555_v9 = vmax.f32 %v482_v8, 0.0  ;;  %v485_v10 = vpop.f32.mrb[12].mxu0 }
 0x198   : > { %v486_v12 = vadd.f32 %v485_v10, %v1609_v37  ;;  %v487_v13 = vpop.f32.mrb[13].mxu0 }
 0x199   : > { %v488_v14 = vadd.f32 %v487_v13, %v1613_v38  ;;  %746 = vmatprep.mubr.f32.mxu1 %v555_v9 }
 0x19a   : > { %747 = vmatmul.mubr.f32.gmra.mrb[10].mxu1 %v554_v11  ;;  %v556_v17 = vmax.f32 %v486_v12, 0.0  ;;  %v640_v12 = vld [vmem:[%s1781_s4] sm:$0x3] }
 0x19b   : > { %v557_v15 = vmax.f32 %v488_v14, 0.0  ;;  %v491_v16 = vpop.f32.mrb[14].mxu0  ;;  %v1652_v13 = vrot.slane %v640_v12, %v375_v34 }
 0x19c   : > { %v492_v18 = vadd.f32 %v491_v16, %v1609_v37  ;;  %v493_v19 = vpop.f32.mrb[15].mxu0 }
 0x19d   : > { %v494_v20 = vadd.f32 %v493_v19, %v1613_v38  ;;  %752 = vmatprep.mubr.f32.mxu1 %v557_v15 }
 0x19e   : > { %753 = vmatmul.mubr.f32.gmra.mrb[12].mxu1 %v556_v17  ;;  %v558_v23 = vmax.f32 %v492_v18, 0.0 }
 0x19f   : > { %v559_v21 = vmax.f32 %v494_v20, 0.0  ;;  %v497_v22 = vpop.f32.mrb[16].mxu0 }
 0x1a0   : > { %v498_v24 = vadd.f32 %v497_v22, %v1609_v37  ;;  %v499_v25 = vpop.f32.mrb[17].mxu0 }
 0x1a1   : > { %v500_v26 = vadd.f32 %v499_v25, %v1613_v38  ;;  %758 = vmatprep.mubr.f32.mxu1 %v559_v21 }
 0x1a2   : > { %759 = vmatmul.mubr.f32.gmra.mrb[14].mxu1 %v558_v23  ;;  %v560_v29 = vmax.f32 %v498_v24, 0.0 }
 0x1a3   : > { %v561_v27 = vmax.f32 %v500_v26, 0.0  ;;  %v503_v28 = vpop.f32.mrb[18].mxu0 }
 0x1a4   : > { %v504_v30 = vadd.f32 %v503_v28, %v1609_v37  ;;  %v505_v31 = vpop.f32.mrb[19].mxu0 }
 0x1a5   : > { %v506_v32 = vadd.f32 %v505_v31, %v1613_v38  ;;  %764 = vmatprep.mubr.f32.mxu1 %v561_v27 }
 0x1a6   : > { %765 = vmatmul.mubr.f32.gmra.mrb[16].mxu1 %v560_v29  ;;  %v562_v40 = vmax.f32 %v504_v30, 0.0 }
 0x1a7   : > { %v563_v35 = vmax.f32 %v506_v32, 0.0  ;;  %v509_v39 = vpop.f32.mrb[20].mxu0 }
 0x1a8   : > { %v510_v41 = vadd.f32 %v509_v39, %v1609_v37  ;;  %v511_v42 = vpop.f32.mrb[21].mxu0 }
 0x1a9   : > { %v512_v43 = vadd.f32 %v511_v42, %v1613_v38  ;;  %770 = vmatprep.mubr.f32.mxu1 %v563_v35 }
 0x1aa   : > { %771 = vmatmul.mubr.f32.gmra.mrb[18].mxu1 %v562_v40  ;;  %v564_v46 = vmax.f32 %v510_v41, 0.0 }
 0x1ab   : > { %v565_v44 = vmax.f32 %v512_v43, 0.0  ;;  %v515_v45 = vpop.f32.mrb[22].mxu0 }
 0x1ac   : > { %v516_v47 = vadd.f32 %v515_v45, %v1609_v37  ;;  %v517_v48 = vpop.f32.mrb[23].mxu0 }
 0x1ad   : > { %v518_v49 = vadd.f32 %v517_v48, %v1613_v38  ;;  %776 = vmatprep.mubr.f32.mxu1 %v565_v44 }
 0x1ae   : > { %777 = vmatmul.mubr.f32.gmra.mrb[20].mxu1 %v564_v46  ;;  %v566_v52 = vmax.f32 %v516_v47, 0.0 }
 0x1af   : > { %v567_v50 = vmax.f32 %v518_v49, 0.0  ;;  %v521_v51 = vpop.f32.mrb[24].mxu0 }
 0x1b0   : > { %v522_v53 = vadd.f32 %v521_v51, %v1609_v37  ;;  %v523_v54 = vpop.f32.mrb[25].mxu0 }
 0x1b1   : > { %v524_v55 = vadd.f32 %v523_v54, %v1613_v38  ;;  %782 = vmatprep.mubr.f32.mxu1 %v567_v50 }
 0x1b2   : > { %783 = vmatmul.mubr.f32.gmra.mrb[22].mxu1 %v566_v52  ;;  %v568_v58 = vmax.f32 %v522_v53, 0.0 }
 0x1b3   : > { %v569_v56 = vmax.f32 %v524_v55, 0.0  ;;  %v527_v57 = vpop.f32.mrb[26].mxu0 }
 0x1b4   : > { %v528_v59 = vadd.f32 %v527_v57, %v1609_v37  ;;  %v529_v60 = vpop.f32.mrb[27].mxu0 }
 0x1b5   : > { %v530_v61 = vadd.f32 %v529_v60, %v1613_v38  ;;  %788 = vmatprep.mubr.f32.mxu1 %v569_v56 }
 0x1b6   : > { %789 = vmatmul.mubr.f32.gmra.mrb[24].mxu1 %v568_v58  ;;  %v570_v0 = vmax.f32 %v528_v59, 0.0 }
 0x1b7   : > { %v571_v62 = vmax.f32 %v530_v61, 0.0  ;;  %v533_v63 = vpop.f32.mrb[28].mxu0 }
 0x1b8   : > { %v534_v1 = vadd.f32 %v533_v63, %v1609_v37  ;;  %v535_v2 = vpop.f32.mrb[29].mxu0 }
 0x1b9   : > { %v536_v3 = vadd.f32 %v535_v2, %v1613_v38  ;;  %794 = vmatprep.mubr.f32.mxu1 %v571_v62 }
 0x1ba   : > { %795 = vmatmul.mubr.f32.gmra.mrb[26].mxu1 %v570_v0  ;;  %v572_v6 = vmax.f32 %v534_v1, 0.0 }
 0x1bb   : > { %v573_v4 = vmax.f32 %v536_v3, 0.0  ;;  %v539_v5 = vpop.f32.mrb[30].mxu0 }
 0x1bc   : > { %v540_v7 = vadd.f32 %v539_v5, %v1609_v37  ;;  %v541_v8 = vpop.f32.mrb[31].mxu0  ;;  %v1656_v37 = vrot.slane %v640_v12, %v379_v36 }
 0x1bd   : > { %v542_v9 = vadd.f32 %v541_v8, %v1613_v38  ;;  %800 = vmatprep.mubr.f32.mxu1 %v573_v4 }
 0x1be   : > { %801 = vmatmul.mubr.f32.gmra.mrb[28].mxu1 %v572_v6  ;;  %v574_v11 = vmax.f32 %v540_v7, 0.0 }
 0x1bf   : > { %v575_v10 = vmax.f32 %v542_v9, 0.0 }
 0x1c1   : > { %806 = vmatprep.mubr.f32.mxu1 %v575_v10 }
 0x1c2   : > { %807 = vmatmul.mubr.f32.gmra.mrb[30].mxu1 %v574_v11 }
 0x259   : > { %v718_v14 = vpop.f32.mrb[0].mxu1 }
 0x25a   : > { %v719_v38 = vadd.f32 %v718_v14, %v1652_v13  ;;  %v720_v15 = vpop.f32.mrb[1].mxu1 }
 0x25b   : > { %v721_v16 = vadd.f32 %v720_v15, %v1656_v37 }
 0x25c   : > { %813 = vst [vmem:[%s1662_s10] sm:$0xff] %v719_v38 }
 0x25d   : > { %814 = vst [vmem:[%s1662_s10 + $0x8] sm:$0xff] %v721_v16  ;;  %v724_v33 = vpop.f32.mrb[2].mxu1 }
 0x25e   : > { %v725_v34 = vadd.f32 %v724_v33, %v1652_v13  ;;  %v726_v36 = vpop.f32.mrb[3].mxu1 }
 0x25f   : > { %v727_v17 = vadd.f32 %v726_v36, %v1656_v37 }
 0x260   : > { %815 = vst [vmem:[%s1662_s10 + $0x10] sm:$0xff] %v725_v34 }
 0x261   : > { %816 = vst [vmem:[%s1662_s10 + $0x18] sm:$0xff] %v727_v17  ;;  %v730_v18 = vpop.f32.mrb[4].mxu1 }
 0x262   : > { %v731_v19 = vadd.f32 %v730_v18, %v1652_v13  ;;  %v732_v20 = vpop.f32.mrb[5].mxu1 }
 0x263   : > { %v733_v21 = vadd.f32 %v732_v20, %v1656_v37 }
 0x264   : > { %817 = vst [vmem:[%s1662_s10 + $0x20] sm:$0xff] %v731_v19 }
 0x265   : > { %818 = vst [vmem:[%s1662_s10 + $0x28] sm:$0xff] %v733_v21  ;;  %v736_v22 = vpop.f32.mrb[6].mxu1 }
 0x266   : > { %v737_v23 = vadd.f32 %v736_v22, %v1652_v13  ;;  %v738_v24 = vpop.f32.mrb[7].mxu1 }
 0x267   : > { %v739_v25 = vadd.f32 %v738_v24, %v1656_v37 }
 0x268   : > { %819 = vst [vmem:[%s1662_s10 + $0x30] sm:$0xff] %v737_v23 }
 0x269   : > { %820 = vst [vmem:[%s1662_s10 + $0x38] sm:$0xff] %v739_v25  ;;  %v742_v26 = vpop.f32.mrb[8].mxu1 }
 0x26a   : > { %v743_v27 = vadd.f32 %v742_v26, %v1652_v13  ;;  %v744_v28 = vpop.f32.mrb[9].mxu1 }
 0x26b   : > { %v745_v29 = vadd.f32 %v744_v28, %v1656_v37 }
 0x26c   : > { %821 = vst [vmem:[%s1662_s10 + $0x40] sm:$0xff] %v743_v27 }
 0x26d   : > { %822 = vst [vmem:[%s1662_s10 + $0x48] sm:$0xff] %v745_v29  ;;  %v748_v30 = vpop.f32.mrb[10].mxu1 }
 0x26e   : > { %v749_v31 = vadd.f32 %v748_v30, %v1652_v13  ;;  %v750_v32 = vpop.f32.mrb[11].mxu1 }
 0x26f   : > { %v751_v35 = vadd.f32 %v750_v32, %v1656_v37 }
 0x270   : > { %823 = vst [vmem:[%s1662_s10 + $0x50] sm:$0xff] %v749_v31 }
 0x271   : > { %824 = vst [vmem:[%s1662_s10 + $0x58] sm:$0xff] %v751_v35  ;;  %v754_v39 = vpop.f32.mrb[12].mxu1 }
 0x272   : > { %v755_v40 = vadd.f32 %v754_v39, %v1652_v13  ;;  %v756_v41 = vpop.f32.mrb[13].mxu1 }
 0x273   : > { %v757_v42 = vadd.f32 %v756_v41, %v1656_v37 }
 0x274   : > { %825 = vst [vmem:[%s1662_s10 + $0x60] sm:$0xff] %v755_v40 }
 0x275   : > { %826 = vst [vmem:[%s1662_s10 + $0x68] sm:$0xff] %v757_v42  ;;  %v760_v43 = vpop.f32.mrb[14].mxu1 }
 0x276   : > { %v761_v44 = vadd.f32 %v760_v43, %v1652_v13  ;;  %v762_v45 = vpop.f32.mrb[15].mxu1 }
 0x277   : > { %v763_v46 = vadd.f32 %v762_v45, %v1656_v37 }
 0x278   : > { %827 = vst [vmem:[%s1662_s10 + $0x70] sm:$0xff] %v761_v44 }
 0x279   : > { %828 = vst [vmem:[%s1662_s10 + $0x78] sm:$0xff] %v763_v46  ;;  %v766_v47 = vpop.f32.mrb[16].mxu1 }
 0x27a   : > { %v767_v48 = vadd.f32 %v766_v47, %v1652_v13  ;;  %v768_v49 = vpop.f32.mrb[17].mxu1 }
 0x27b   : > { %v769_v50 = vadd.f32 %v768_v49, %v1656_v37 }
 0x27c   : > { %829 = vst [vmem:[%s1662_s10 + $0x80] sm:$0xff] %v767_v48 }
 0x27d   : > { %830 = vst [vmem:[%s1662_s10 + $0x88] sm:$0xff] %v769_v50  ;;  %v772_v51 = vpop.f32.mrb[18].mxu1 }
 0x27e   : > { %v773_v52 = vadd.f32 %v772_v51, %v1652_v13  ;;  %v774_v53 = vpop.f32.mrb[19].mxu1 }
 0x27f   : > { %v775_v54 = vadd.f32 %v774_v53, %v1656_v37 }
 0x280   : > { %831 = vst [vmem:[%s1662_s10 + $0x90] sm:$0xff] %v773_v52 }
 0x281   : > { %832 = vst [vmem:[%s1662_s10 + $0x98] sm:$0xff] %v775_v54  ;;  %v778_v55 = vpop.f32.mrb[20].mxu1 }
 0x282   : > { %v779_v56 = vadd.f32 %v778_v55, %v1652_v13  ;;  %v780_v57 = vpop.f32.mrb[21].mxu1 }
 0x283   : > { %v781_v58 = vadd.f32 %v780_v57, %v1656_v37 }
 0x284   : > { %833 = vst [vmem:[%s1662_s10 + $0xa0] sm:$0xff] %v779_v56 }
 0x285   : > { %834 = vst [vmem:[%s1662_s10 + $0xa8] sm:$0xff] %v781_v58  ;;  %v784_v59 = vpop.f32.mrb[22].mxu1 }
 0x286   : > { %v785_v60 = vadd.f32 %v784_v59, %v1652_v13  ;;  %v786_v61 = vpop.f32.mrb[23].mxu1 }
 0x287   : > { %v787_v62 = vadd.f32 %v786_v61, %v1656_v37 }
 0x288   : > { %835 = vst [vmem:[%s1662_s10 + $0xb0] sm:$0xff] %v785_v60 }
 0x289   : > { %836 = vst [vmem:[%s1662_s10 + $0xb8] sm:$0xff] %v787_v62  ;;  %v790_v63 = vpop.f32.mrb[24].mxu1 }
 0x28a   : > { %v791_v0 = vadd.f32 %v790_v63, %v1652_v13  ;;  %v792_v1 = vpop.f32.mrb[25].mxu1 }
 0x28b   : > { %v793_v2 = vadd.f32 %v792_v1, %v1656_v37 }
 0x28c   : > { %837 = vst [vmem:[%s1662_s10 + $0xc0] sm:$0xff] %v791_v0 }
 0x28d   : > { %838 = vst [vmem:[%s1662_s10 + $0xc8] sm:$0xff] %v793_v2  ;;  %v796_v3 = vpop.f32.mrb[26].mxu1 }
 0x28e   : > { %v797_v4 = vadd.f32 %v796_v3, %v1652_v13  ;;  %v798_v5 = vpop.f32.mrb[27].mxu1 }
 0x28f   : > { %v799_v6 = vadd.f32 %v798_v5, %v1656_v37 }
 0x290   : > { %839 = vst [vmem:[%s1662_s10 + $0xd0] sm:$0xff] %v797_v4 }
 0x291   : > { %840 = vst [vmem:[%s1662_s10 + $0xd8] sm:$0xff] %v799_v6  ;;  %v802_v7 = vpop.f32.mrb[28].mxu1 }
 0x292   : > { %v803_v8 = vadd.f32 %v802_v7, %v1652_v13  ;;  %v804_v9 = vpop.f32.mrb[29].mxu1 }
 0x293   : > { %v805_v10 = vadd.f32 %v804_v9, %v1656_v37 }
 0x294   : > { %841 = vst [vmem:[%s1662_s10 + $0xe0] sm:$0xff] %v803_v8 }
 0x295   : > { %842 = vst [vmem:[%s1662_s10 + $0xe8] sm:$0xff] %v805_v10  ;;  %v808_v11 = vpop.f32.mrb[30].mxu1 }
 0x296   : > { %v809_v12 = vadd.f32 %v808_v11, %v1652_v13  ;;  %v810_v14 = vpop.f32.mrb[31].mxu1 }
 0x297   : > { %v811_v38 = vadd.f32 %v810_v14, %v1656_v37 }
 0x298   : > { %843 = vst [vmem:[%s1662_s10 + $0xf0] sm:$0xff] %v809_v12 }
 0x299   : > { %844 = vst [vmem:[%s1662_s10 + $0xf8] sm:$0xff] %v811_v38 }
 0x29a   : > { %1274 = shalt.err (!%p1271_p1)
}
 0x29b   : > { %s1275_s12 = scalar_lea.hbm %s1728_s11, 4096  ;;  %s1279_s15 = scalar_lea.hbm %s1782_s5, 8192 }
 0x29c   : > { %p1276_p13 = scmp.ne.s32.totalorder %s1728_s11, %s1275_s12  ;;  %p1280_p4 = scmp.lt.u32.totalorder %s1728_s11, %s1782_s5 }
 0x29d   : > { %p1281_p5 = scmp.lt.u32.totalorder %s1279_s15, %s1275_s12  ;;  %p1283_p11 = scmp.lt.u32.totalorder %s1275_s12, %s1728_s11 }
 0x29e   : > { %p1277_p6 = pnand %p1276_p13, %p1796_p0 }
 0x29f   : > { %p1282_p8 = por %p1281_p5, %p1280_p4 }
 0x2a0   : > { %p1278_p10 = pneg %p1277_p6 }
 0x2a1   : > { %p1284_p2 = por %p1283_p11, %p1282_p8 }
 0x2a3   : > { %p1285_p3 = pnand %p1284_p2, %p1278_p10 }
 0x2a5   : > { %1288 = shalt.err (!%p1285_p3)
}
 0x2a6   : > { %s1339_s28 = smov 256   ;;  %s1340_s9 = smov 16  }
 0x2a7   : > { %1114 = dma.vmem_to_hbm [thread:$0]  (%p1796_p0), %s1730_s13, 4096, %s1728_s11, %s846_s22, %s1339_s28, %s1339_s28, %s1340_s9  }
 0x2a8 PF: > { %s875_s30 = sand.u32 1, %s1319_s18   ;;  %p1797_p7 = scmp.ne.s32.totalorder %s1787_s25, 0 }
 0x2a9   : > { %p1798_p9 = scmp.ge.s32.totalorder %s1331_s21, 2  ;;  %s876_s17 = scalar_lea.sflag [#allocation4], %s875_s30 }
 0x2ab   : > { %p1128_p12 = pnand %p1798_p9, %p1797_p7 }
 0x2ad   : > { %1314 = dma.done.wait (!%p1128_p12), %s876_s17, 4096  }
 0x2ae   : > { %1316 = vsyncadd (!%p1128_p12), %s876_s17, 4294963200  ;;  %p19_p1 = scmp.ge.s32.totalorder %s1487_s29, 4   ;;  %s1799_s18 = smov %s1323_s19 }
 0x2af   : > { %s1800_s19 = smov %s1327_s20  ;;  %s1801_s20 = smov %s1503_s27 }
 0x2b0   : > { %s1802_s21 = smov %s1487_s29  ;;  %21 = sbr.rel (!%p19_p1) target bundleno = 6 (0x6), region = 93 }
 0x2b7   :  { %881 = vsyncpa [#allocation3], 1 }
 0x2b8   :  { %883 = vsyncpa [#allocation3 + $0x1], 1 }
 0x2b9   :  { %884 = vsyncpa [#allocation6], 1 }
 0x2ba   :  { %885 = vsyncpa [#allocation4], 1 }
 0x2bb   :  { %887 = vsyncpa [#allocation4 + $0x1], 1 }

</bundles_post_ra>
